<compile_context>
chip_gen: v7x
topology: tpu7x:2x2x1
jax: 0.10.0
libtpu: 0.0.40
codegen_flags: <defaults>
</compile_context>

<pallas_src>
import functools
import math

import jax
import jax.numpy as jnp
from jax.experimental import pallas as pl
from jax.experimental.pallas import tpu as pltpu


# ----------------------------------------------------------------------------
# Config / layout constants
# ----------------------------------------------------------------------------
CFG = dict(hidden=128, layers=2, heads=2, intermediate=256,
           vocab=100, max_pos=16, type_vocab=2, num_labels=19)

DH_PAD = 128    # per-head Q/K/V slot width (head_dim zero-padded to 128 lanes)
CLS_PAD = 128   # lane-dense classifier output width (sliced to num_labels)
EPS = 1e-12


# ----------------------------------------------------------------------------
# Shared in-kernel helpers (all f32 statistics)
# ----------------------------------------------------------------------------
def _layer_norm(x, g, b, eps):
    mu = jnp.mean(x, axis=-1, keepdims=True)
    var = jnp.mean((x - mu) * (x - mu), axis=-1, keepdims=True)
    return (x - mu) * jax.lax.rsqrt(var + eps) * g + b


def _gelu(x):
    # TODO(synk): HF BERT uses exact erf-based GELU; tanh approximation used
    # here for guaranteed Mosaic lowering (numerical diff ~1e-3).
    c = math.sqrt(2.0 / math.pi)
    return 0.5 * x * (1.0 + jnp.tanh(c * (x + 0.044715 * x * x * x)))


# ----------------------------------------------------------------------------
# The single fused kernel: grid=(L,), activation resident in VMEM scratch
# ----------------------------------------------------------------------------
def _bert_kernel(emb_ref, mask_ref, emb_g_ref, emb_b_ref,
                 wqkv_ref, bqkv_ref, wo_ref, bo_ref,
                 ln1_g_ref, ln1_b_ref, w1_ref, b1_ref, w2_ref, b2_ref,
                 ln2_g_ref, ln2_b_ref,
                 pool_w_ref, pool_b_ref, cls_w_ref, cls_b_ref,
                 logits_ref, x_ref,
                 *, batch, seq, heads, dh_pad, scale, eps):
    layer = pl.program_id(0)
    BS, H = x_ref.shape

    # ---- prologue (layer 0): embedding LayerNorm into the resident activation
    @pl.when(layer == 0)
    def _():
        x_ref[...] = _layer_norm(emb_ref[...], emb_g_ref[...], emb_b_ref[...], eps)

    x = x_ref[...]                      # (B*S, H) f32, VMEM-resident
    mask = mask_ref[...]                # (B, 1, S) additive f32 key mask

    # ---- fused QKV projection, all B*S tokens folded into M (one MXU stream)
    qkv = jnp.dot(x.astype(jnp.bfloat16), wqkv_ref[0],
                  preferred_element_type=jnp.float32) + bqkv_ref[0]

    # ---- per-head attention; every head slice is 128-lane aligned, ctx is
    #      accumulated straight into the output projection (no concat).
    # TODO(synk): at real head counts (12) use lax.fori_loop(unroll=True) to
    # bound live ranges instead of a static Python loop.
    attn = jnp.zeros((BS, H), jnp.float32)
    for h in range(heads):
        base = h * 3 * dh_pad
        q = qkv[:, base:base + dh_pad].reshape(batch, seq, dh_pad)
        k = qkv[:, base + dh_pad:base + 2 * dh_pad].reshape(batch, seq, dh_pad)
        v = qkv[:, base + 2 * dh_pad:base + 3 * dh_pad].reshape(batch, seq, dh_pad)
        # (B, S, S) scores; zero-padded lanes contribute nothing to the dot.
        s = jax.lax.dot_general(q.astype(jnp.bfloat16), k.astype(jnp.bfloat16),
                                (((2,), (2,)), ((0,), (0,))),
                                preferred_element_type=jnp.float32)
        s = s * scale + mask            # mask broadcast over the query axis
        s = s - jnp.max(s, axis=-1, keepdims=True)
        p = jnp.exp(s)
        p = p * pl.reciprocal(jnp.sum(p, axis=-1, keepdims=True), approx=True)
        ctx = jax.lax.dot_general(p.astype(jnp.bfloat16), v.astype(jnp.bfloat16),
                                  (((2,), (1,)), ((0,), (0,))),
                                  preferred_element_type=jnp.float32)
        attn = attn + jnp.dot(ctx.reshape(BS, dh_pad).astype(jnp.bfloat16),
                              wo_ref[0, h],
                              preferred_element_type=jnp.float32)
    attn = attn + bo_ref[0]

    # ---- residual + LN1, FFN(GELU), residual + LN2 (all VMEM-resident)
    x1 = _layer_norm(x + attn, ln1_g_ref[0], ln1_b_ref[0], eps)
    h1 = _gelu(jnp.dot(x1.astype(jnp.bfloat16), w1_ref[0],
                       preferred_element_type=jnp.float32) + b1_ref[0])
    ff = jnp.dot(h1.astype(jnp.bfloat16), w2_ref[0],
                 preferred_element_type=jnp.float32) + b2_ref[0]
    x2 = _layer_norm(x1 + ff, ln2_g_ref[0], ln2_b_ref[0], eps)
    x_ref[...] = x2

    # ---- epilogue (last layer): pooler(tanh) + Dropout(identity) + classifier
    @pl.when(layer == pl.num_programs(0) - 1)
    def _():
        cls = x2.reshape(batch, seq, H)[:, 0, :]            # (B, H) [CLS] rows
        pooled = jnp.tanh(jnp.dot(cls.astype(jnp.bfloat16), pool_w_ref[...],
                                  preferred_element_type=jnp.float32)
                          + pool_b_ref[...])
        # TODO(synk): Dropout(0.3) is identity at inference; training would
        # need pltpu.prng_seed / prng_random_bits masking here.
        logits_ref[...] = (jnp.dot(pooled.astype(jnp.bfloat16), cls_w_ref[...],
                                   preferred_element_type=jnp.float32)
                           + cls_b_ref[...]).astype(logits_ref.dtype)


# ----------------------------------------------------------------------------
# Wrapper: one pallas_call for embeddings-LN + all layers + pooler + classifier
# ----------------------------------------------------------------------------
def bert_encoder_head(emb_flat, mask_add, p, cfg, *, B, S):
    H, I, L = cfg["hidden"], cfg["intermediate"], cfg["layers"]
    heads = cfg["heads"]
    dh = H // heads
    W3 = heads * 3 * DH_PAD
    scale = 1.0 / math.sqrt(dh)

    const2 = lambda l: (0, 0)
    const3 = lambda l: (0, 0, 0)
    lyr3 = lambda l: (l, 0, 0)
    lyr4 = lambda l: (l, 0, 0, 0)

    kernel = functools.partial(_bert_kernel, batch=B, seq=S, heads=heads,
                               dh_pad=DH_PAD, scale=scale, eps=EPS)

    return pl.pallas_call(
        kernel,
        out_shape=jax.ShapeDtypeStruct((B, CLS_PAD), jnp.float32),
        grid=(L,),
        in_specs=[
            pl.BlockSpec((B * S, H), const2),            # emb (post-gather, pre-LN)
            pl.BlockSpec((B, 1, S), const3),             # additive key mask
            pl.BlockSpec((1, H), const2),                # emb LN gamma
            pl.BlockSpec((1, H), const2),                # emb LN beta
            pl.BlockSpec((1, H, W3), lyr3),              # wqkv (bf16, head-aligned)
            pl.BlockSpec((1, 1, W3), lyr3),              # bqkv
            pl.BlockSpec((1, heads, DH_PAD, H), lyr4),   # wo per head (bf16)
            pl.BlockSpec((1, 1, H), lyr3),               # bo
            pl.BlockSpec((1, 1, H), lyr3),               # ln1 gamma
            pl.BlockSpec((1, 1, H), lyr3),               # ln1 beta
            pl.BlockSpec((1, H, I), lyr3),               # w1 (bf16)
            pl.BlockSpec((1, 1, I), lyr3),               # b1
            pl.BlockSpec((1, I, H), lyr3),               # w2 (bf16)
            pl.BlockSpec((1, 1, H), lyr3),               # b2
            pl.BlockSpec((1, 1, H), lyr3),               # ln2 gamma
            pl.BlockSpec((1, 1, H), lyr3),               # ln2 beta
            pl.BlockSpec((H, H), const2),                # pooler weight (bf16)
            pl.BlockSpec((1, H), const2),                # pooler bias
            pl.BlockSpec((H, CLS_PAD), const2),          # classifier weight (bf16, padded)
            pl.BlockSpec((1, CLS_PAD), const2),          # classifier bias (padded)
        ],
        out_specs=pl.BlockSpec((B, CLS_PAD), const2),
        scratch_shapes=[pltpu.VMEM((B * S, H), jnp.float32)],   # resident activation
        compiler_params=pltpu.CompilerParams(dimension_semantics=("arbitrary",)),
    )(emb_flat, mask_add, p["emb_ln_g"], p["emb_ln_b"],
      p["wqkv"], p["bqkv"], p["wo"], p["bo"],
      p["ln1_g"], p["ln1_b"], p["w1"], p["b1"], p["w2"], p["b2"],
      p["ln2_g"], p["ln2_b"],
      p["pool_w"], p["pool_b"], p["cls_w_pad"], p["cls_b_pad"])


def bert_class_forward(params, input_ids, attention_mask, token_type_ids, cfg):
    B, S = input_ids.shape
    H = cfg["hidden"]

    # Embedding gathers are glue (XLA); everything else is the fused kernel.
    pos_ids = jnp.arange(S, dtype=jnp.int32)
    emb = (jnp.take(params["word_emb"], input_ids, axis=0)
           + jnp.take(params["pos_emb"], pos_ids, axis=0)[None, :, :]
           + jnp.take(params["type_emb"], token_type_ids, axis=0))
    emb_flat = emb.reshape(B * S, H)

    # Additive key mask [B, 1, S]; broadcast inside the kernel (no [B,S,S] HBM tensor).
    mask_add = ((1.0 - attention_mask.astype(jnp.float32)) * -1e9).reshape(B, 1, S)

    logits_pad = bert_encoder_head(emb_flat, mask_add, params, cfg, B=B, S=S)
    return logits_pad[:, :cfg["num_labels"]]


# ----------------------------------------------------------------------------
# Parameter initialization (deterministic, synthetic, kernel-friendly layout)
# ----------------------------------------------------------------------------
def init_params(key, cfg):
    H, I, L = cfg["hidden"], cfg["intermediate"], cfg["layers"]
    heads, NL = cfg["heads"], cfg["num_labels"]
    dh = H // heads
    keys = iter(jax.random.split(key, 128))

    def nrm(shape):
        return 0.02 * jax.random.normal(next(keys), shape, jnp.float32)

    # Per-layer weights, packed head-aligned (zero runtime cost) and stacked on L.
    wqkv_l, wo_l, w1_l, w2_l = [], [], [], []
    for _ in range(L):
        wq, wk, wv, wo = nrm((H, H)), nrm((H, H)), nrm((H, H)), nrm((H, H))
        wqkv_pad = jnp.zeros((H, heads * 3 * DH_PAD), jnp.float32)
        wo_pad = jnp.zeros((heads, DH_PAD, H), jnp.float32)
        for h in range(heads):
            base = h * 3 * DH_PAD
            wqkv_pad = wqkv_pad.at[:, base:base + dh].set(wq[:, h * dh:(h + 1) * dh])
            wqkv_pad = wqkv_pad.at[:, base + DH_PAD:base + DH_PAD + dh].set(
                wk[:, h * dh:(h + 1) * dh])
            wqkv_pad = wqkv_pad.at[:, base + 2 * DH_PAD:base + 2 * DH_PAD + dh].set(
                wv[:, h * dh:(h + 1) * dh])
            wo_pad = wo_pad.at[h, :dh, :].set(wo[h * dh:(h + 1) * dh, :])
        wqkv_l.append(wqkv_pad)
        wo_l.append(wo_pad)
        w1_l.append(nrm((H, I)))
        w2_l.append(nrm((I, H)))

    cls_w = nrm((H, NL))
    cls_w_pad = jnp.zeros((H, CLS_PAD), jnp.float32).at[:, :NL].set(cls_w)

    return dict(
        word_emb=nrm((cfg["vocab"], H)),
        pos_emb=nrm((cfg["max_pos"], H)),
        type_emb=nrm((cfg["type_vocab"], H)),
        emb_ln_g=jnp.ones((1, H), jnp.float32),
        emb_ln_b=jnp.zeros((1, H), jnp.float32),
        wqkv=jnp.stack(wqkv_l).astype(jnp.bfloat16),          # (L, H, heads*3*128)
        bqkv=jnp.zeros((L, 1, heads * 3 * DH_PAD), jnp.float32),
        wo=jnp.stack(wo_l).astype(jnp.bfloat16),              # (L, heads, 128, H)
        bo=jnp.zeros((L, 1, H), jnp.float32),
        ln1_g=jnp.ones((L, 1, H), jnp.float32),
        ln1_b=jnp.zeros((L, 1, H), jnp.float32),
        w1=jnp.stack(w1_l).astype(jnp.bfloat16),              # (L, H, I)
        b1=jnp.zeros((L, 1, I), jnp.float32),
        w2=jnp.stack(w2_l).astype(jnp.bfloat16),              # (L, I, H)
        b2=jnp.zeros((L, 1, H), jnp.float32),
        ln2_g=jnp.ones((L, 1, H), jnp.float32),
        ln2_b=jnp.zeros((L, 1, H), jnp.float32),
        pool_w=nrm((H, H)).astype(jnp.bfloat16),
        pool_b=jnp.zeros((1, H), jnp.float32),
        cls_w_pad=cls_w_pad.astype(jnp.bfloat16),
        cls_b_pad=jnp.zeros((1, CLS_PAD), jnp.float32),
    )


# ----------------------------------------------------------------------------
# Pure-JAX reference (same dtypes/packing, exact softmax division) for checking
# ----------------------------------------------------------------------------
def reference_forward(p, input_ids, attention_mask, token_type_ids, cfg):
    B, S = input_ids.shape
    H, heads, L = cfg["hidden"], cfg["heads"], cfg["layers"]
    dh = H // heads
    scale = 1.0 / math.sqrt(dh)
    pos_ids = jnp.arange(S, dtype=jnp.int32)
    emb = (jnp.take(p["word_emb"], input_ids, axis=0)
           + jnp.take(p["pos_emb"], pos_ids, axis=0)[None, :, :]
           + jnp.take(p["type_emb"], token_type_ids, axis=0)).reshape(B * S, H)
    x = _layer_norm(emb, p["emb_ln_g"], p["emb_ln_b"], EPS)
    mask = ((1.0 - attention_mask.astype(jnp.float32)) * -1e9).reshape(B, 1, S)
    for l in range(L):
        qkv = jnp.dot(x.astype(jnp.bfloat16), p["wqkv"][l],
                      preferred_element_type=jnp.float32) + p["bqkv"][l]
        attn = jnp.zeros((B * S, H), jnp.float32)
        for h in range(heads):
            base = h * 3 * DH_PAD
            q = qkv[:, base:base + DH_PAD].reshape(B, S, DH_PAD)
            k = qkv[:, base + DH_PAD:base + 2 * DH_PAD].reshape(B, S, DH_PAD)
            v = qkv[:, base + 2 * DH_PAD:base + 3 * DH_PAD].reshape(B, S, DH_PAD)
            s = jnp.einsum("bqd,bkd->bqk", q.astype(jnp.bfloat16),
                           k.astype(jnp.bfloat16),
                           preferred_element_type=jnp.float32) * scale + mask
            prob = jax.nn.softmax(s, axis=-1)
            ctx = jnp.einsum("bqk,bkd->bqd", prob.astype(jnp.bfloat16),
                             v.astype(jnp.bfloat16),
                             preferred_element_type=jnp.float32).reshape(B * S, DH_PAD)
            attn = attn + jnp.dot(ctx.astype(jnp.bfloat16), p["wo"][l, h],
                                  preferred_element_type=jnp.float32)
        attn = attn + p["bo"][l]
        x1 = _layer_norm(x + attn, p["ln1_g"][l], p["ln1_b"][l], EPS)
        h1 = _gelu(jnp.dot(x1.astype(jnp.bfloat16), p["w1"][l],
                           preferred_element_type=jnp.float32) + p["b1"][l])
        ff = jnp.dot(h1.astype(jnp.bfloat16), p["w2"][l],
                     preferred_element_type=jnp.float32) + p["b2"][l]
        x = _layer_norm(x1 + ff, p["ln2_g"][l], p["ln2_b"][l], EPS)
    cls = x.reshape(B, S, H)[:, 0, :]
    pooled = jnp.tanh(jnp.dot(cls.astype(jnp.bfloat16), p["pool_w"],
                              preferred_element_type=jnp.float32) + p["pool_b"])
    logits = jnp.dot(pooled.astype(jnp.bfloat16), p["cls_w_pad"],
                     preferred_element_type=jnp.float32) + p["cls_b_pad"]
    return logits[:, :cfg["num_labels"]]


# ----------------------------------------------------------------------------
if __name__ == "__main__":
    key = jax.random.PRNGKey(0)
    pkey, ikey, tkey = jax.random.split(key, 3)

    B, S = 2, 8
    params = init_params(pkey, CFG)

    input_ids = jax.random.randint(ikey, (B, S), 0, CFG["vocab"], dtype=jnp.int32)
    token_type_ids = jax.random.randint(tkey, (B, S), 0, CFG["type_vocab"],
                                        dtype=jnp.int32)
    # second example padded in the last two positions to exercise masking
    attention_mask = jnp.array([[1] * S, [1] * (S - 2) + [0, 0]], dtype=jnp.int32)

    logits = bert_class_forward(params, input_ids, attention_mask,
                                token_type_ids, CFG)
    logits = jax.block_until_ready(logits)
    assert logits.shape == (B, CFG["num_labels"])
    assert bool(jnp.all(jnp.isfinite(logits)))

    ref = jax.block_until_ready(
        reference_forward(params, input_ids, attention_mask, token_type_ids, CFG))
    max_diff = float(jnp.max(jnp.abs(logits - ref)))
    assert max_diff < 1e-2, f"kernel vs reference mismatch: {max_diff}"

    print("KERNEL_OK")
</pallas_src>

<mosaic_0001>
module attributes {stable_mosaic.version = 11 : i64} {
  func.func @_bert_kernel(%arg0: i32, %arg1: memref<16x128xf32, #tpu.memory_space<vmem>>, %arg2: memref<2x1x8xf32, #tpu.memory_space<vmem>>, %arg3: memref<1x128xf32, #tpu.memory_space<vmem>>, %arg4: memref<1x128xf32, #tpu.memory_space<vmem>>, %arg5: memref<1x128x768xbf16, #tpu.memory_space<vmem>>, %arg6: memref<1x1x768xf32, #tpu.memory_space<vmem>>, %arg7: memref<1x2x128x128xbf16, #tpu.memory_space<vmem>>, %arg8: memref<1x1x128xf32, #tpu.memory_space<vmem>>, %arg9: memref<1x1x128xf32, #tpu.memory_space<vmem>>, %arg10: memref<1x1x128xf32, #tpu.memory_space<vmem>>, %arg11: memref<1x128x256xbf16, #tpu.memory_space<vmem>>, %arg12: memref<1x1x256xf32, #tpu.memory_space<vmem>>, %arg13: memref<1x256x128xbf16, #tpu.memory_space<vmem>>, %arg14: memref<1x1x128xf32, #tpu.memory_space<vmem>>, %arg15: memref<1x1x128xf32, #tpu.memory_space<vmem>>, %arg16: memref<1x1x128xf32, #tpu.memory_space<vmem>>, %arg17: memref<128x128xbf16, #tpu.memory_space<vmem>>, %arg18: memref<1x128xf32, #tpu.memory_space<vmem>>, %arg19: memref<128x128xbf16, #tpu.memory_space<vmem>>, %arg20: memref<1x128xf32, #tpu.memory_space<vmem>>, %arg21: memref<2x128xf32, #tpu.memory_space<vmem>>, %arg22: memref<16x128xf32, #tpu.memory_space<vmem>>) attributes {dimension_semantics = [#tpu.dimension_semantics<arbitrary>], iteration_bounds = array<i64: 2>, scalar_prefetch = 0 : i64, scratch_operands = 1 : i64, tpu.core_type = #tpu.core_type<tc>, window_params = [{pipeline_mode = #tpu.pipeline_mode<synchronous>, transform_indices = @transform_0, window_bounds = array<i64: 16, 128>}, {pipeline_mode = #tpu.pipeline_mode<synchronous>, transform_indices = @transform_1, window_bounds = array<i64: 2, 1, 8>}, {pipeline_mode = #tpu.pipeline_mode<synchronous>, transform_indices = @transform_2, window_bounds = array<i64: 1, 128>}, {pipeline_mode = #tpu.pipeline_mode<synchronous>, transform_indices = @transform_3, window_bounds = array<i64: 1, 128>}, {transform_indices = @transform_4, window_bounds = array<i64: 1, 128, 768>}, {transform_indices = @transform_5, window_bounds = array<i64: 1, 1, 768>}, {transform_indices = @transform_6, window_bounds = array<i64: 1, 2, 128, 128>}, {transform_indices = @transform_7, window_bounds = array<i64: 1, 1, 128>}, {transform_indices = @transform_8, window_bounds = array<i64: 1, 1, 128>}, {transform_indices = @transform_9, window_bounds = array<i64: 1, 1, 128>}, {transform_indices = @transform_10, window_bounds = array<i64: 1, 128, 256>}, {transform_indices = @transform_11, window_bounds = array<i64: 1, 1, 256>}, {transform_indices = @transform_12, window_bounds = array<i64: 1, 256, 128>}, {transform_indices = @transform_13, window_bounds = array<i64: 1, 1, 128>}, {transform_indices = @transform_14, window_bounds = array<i64: 1, 1, 128>}, {transform_indices = @transform_15, window_bounds = array<i64: 1, 1, 128>}, {pipeline_mode = #tpu.pipeline_mode<synchronous>, transform_indices = @transform_16, window_bounds = array<i64: 128, 128>}, {pipeline_mode = #tpu.pipeline_mode<synchronous>, transform_indices = @transform_17, window_bounds = array<i64: 1, 128>}, {pipeline_mode = #tpu.pipeline_mode<synchronous>, transform_indices = @transform_18, window_bounds = array<i64: 128, 128>}, {pipeline_mode = #tpu.pipeline_mode<synchronous>, transform_indices = @transform_19, window_bounds = array<i64: 1, 128>}, {pipeline_mode = #tpu.pipeline_mode<synchronous>, transform_indices = @transform_20, window_bounds = array<i64: 2, 128>}]} {
    %c0_i32 = arith.constant 0 : i32
    %0 = arith.cmpi eq, %arg0, %c0_i32 : i32
    %1 = arith.extui %0 : i1 to i32
    %c0_i32_0 = arith.constant 0 : i32
    %2 = arith.cmpi ne, %1, %c0_i32_0 : i32
    scf.if %2 {
      %c0_77 = arith.constant 0 : index
      %c0_78 = arith.constant 0 : index
      %173 = vector.load %arg1[%c0_77, %c0_78] : memref<16x128xf32, #tpu.memory_space<vmem>>, vector<16x128xf32>
      %c0_79 = arith.constant 0 : index
      %c0_80 = arith.constant 0 : index
      %174 = vector.load %arg3[%c0_79, %c0_80] : memref<1x128xf32, #tpu.memory_space<vmem>>, vector<1x128xf32>
      %c0_81 = arith.constant 0 : index
      %c0_82 = arith.constant 0 : index
      %175 = vector.load %arg4[%c0_81, %c0_82] : memref<1x128xf32, #tpu.memory_space<vmem>>, vector<1x128xf32>
      %cst_83 = arith.constant dense<0.000000e+00> : vector<16xf32>
      %176 = vector.multi_reduction <add>, %173, %cst_83 [1] : vector<16x128xf32> to vector<16xf32>
      %177 = vector.shape_cast %176 : vector<16xf32> to vector<16x1xf32>
      %cst_84 = arith.constant 1.280000e+02 : f32
      %178 = vector.broadcast %cst_84 : f32 to vector<16x1xf32>
      %179 = arith.divf %177, %178 : vector<16x1xf32>
      %180 = vector.broadcast %179 : vector<16x1xf32> to vector<16x128xf32>
      %181 = arith.subf %173, %180 : vector<16x128xf32>
      %182 = vector.broadcast %179 : vector<16x1xf32> to vector<16x128xf32>
      %183 = arith.subf %173, %182 : vector<16x128xf32>
      %184 = arith.mulf %181, %183 : vector<16x128xf32>
      %cst_85 = arith.constant dense<0.000000e+00> : vector<16xf32>
      %185 = vector.multi_reduction <add>, %184, %cst_85 [1] : vector<16x128xf32> to vector<16xf32>
      %186 = vector.shape_cast %185 : vector<16xf32> to vector<16x1xf32>
      %cst_86 = arith.constant 1.280000e+02 : f32
      %187 = vector.broadcast %cst_86 : f32 to vector<16x1xf32>
      %188 = arith.divf %186, %187 : vector<16x1xf32>
      %189 = vector.broadcast %179 : vector<16x1xf32> to vector<16x128xf32>
      %190 = arith.subf %173, %189 : vector<16x128xf32>
      %cst_87 = arith.constant 9.99999996E-13 : f32
      %191 = vector.broadcast %cst_87 : f32 to vector<16x1xf32>
      %192 = arith.addf %188, %191 : vector<16x1xf32>
      %193 = math.rsqrt %192 : vector<16x1xf32>
      %194 = vector.broadcast %193 : vector<16x1xf32> to vector<16x128xf32>
      %195 = arith.mulf %190, %194 : vector<16x128xf32>
      %196 = vector.broadcast %174 : vector<1x128xf32> to vector<16x128xf32>
      %197 = arith.mulf %195, %196 : vector<16x128xf32>
      %198 = vector.broadcast %175 : vector<1x128xf32> to vector<16x128xf32>
      %199 = arith.addf %197, %198 : vector<16x128xf32>
      %c0_88 = arith.constant 0 : index
      %c0_89 = arith.constant 0 : index
      %200 = vector.load %arg22[%c0_88, %c0_89] : memref<16x128xf32, #tpu.memory_space<vmem>>, vector<16x128xf32>
      tpu.vector_store %arg22[%c0_88, %c0_89], %199 {strides = array<i32>} : memref<16x128xf32, #tpu.memory_space<vmem>>, vector<16x128xf32>,
    } else {
    }
    %c0 = arith.constant 0 : index
    %c0_1 = arith.constant 0 : index
    %3 = vector.load %arg22[%c0, %c0_1] : memref<16x128xf32, #tpu.memory_space<vmem>>, vector<16x128xf32>
    %c0_2 = arith.constant 0 : index
    %c0_3 = arith.constant 0 : index
    %c0_4 = arith.constant 0 : index
    %4 = vector.load %arg2[%c0_2, %c0_3, %c0_4] : memref<2x1x8xf32, #tpu.memory_space<vmem>>, vector<2x1x8xf32>
    %5 = arith.truncf %3 : vector<16x128xf32> to vector<16x128xbf16>
    %c0_5 = arith.constant 0 : index
    %c0_6 = arith.constant 0 : index
    %c0_7 = arith.constant 0 : index
    %6 = vector.load %arg5[%c0_5, %c0_6, %c0_7] : memref<1x128x768xbf16, #tpu.memory_space<vmem>>, vector<1x128x768xbf16>
    %7 = vector.shape_cast %6 : vector<1x128x768xbf16> to vector<128x768xbf16>
    %cst = arith.constant dense<0.000000e+00> : vector<16x768xf32>
    %8 = tpu.matmul %5, %7, %cst {dimension_numbers = #tpu.dot_dimension_numbers<[1], [0], [0], [1], [0, 0, 1, 1], [], []>} : vector<16x128xbf16>, vector<128x768xbf16>, vector<16x768xf32> -> vector<16x768xf32>
    %c0_8 = arith.constant 0 : index
    %c0_9 = arith.constant 0 : index
    %c0_10 = arith.constant 0 : index
    %9 = vector.load %arg6[%c0_8, %c0_9, %c0_10] : memref<1x1x768xf32, #tpu.memory_space<vmem>>, vector<1x1x768xf32>
    %10 = vector.shape_cast %9 : vector<1x1x768xf32> to vector<1x768xf32>
    %11 = vector.broadcast %10 : vector<1x768xf32> to vector<16x768xf32>
    %12 = arith.addf %8, %11 : vector<16x768xf32>
    %cst_11 = arith.constant 0.000000e+00 : f32
    %13 = vector.broadcast %cst_11 : f32 to vector<16x128xf32>
    %14 = vector.extract_strided_slice %12 {offsets = [0, 0], sizes = [16, 128], strides = [1, 1]} : vector<16x768xf32> to vector<16x128xf32>
    %15 = vector.shape_cast %14 : vector<16x128xf32> to vector<2x8x128xf32>
    %16 = vector.extract_strided_slice %12 {offsets = [0, 128], sizes = [16, 128], strides = [1, 1]} : vector<16x768xf32> to vector<16x128xf32>
    %17 = vector.shape_cast %16 : vector<16x128xf32> to vector<2x8x128xf32>
    %18 = vector.extract_strided_slice %12 {offsets = [0, 256], sizes = [16, 128], strides = [1, 1]} : vector<16x768xf32> to vector<16x128xf32>
    %19 = vector.shape_cast %18 : vector<16x128xf32> to vector<2x8x128xf32>
    %20 = arith.truncf %15 : vector<2x8x128xf32> to vector<2x8x128xbf16>
    %21 = arith.truncf %17 : vector<2x8x128xf32> to vector<2x8x128xbf16>
    %cst_12 = arith.constant dense<0.000000e+00> : vector<2x8x8xf32>
    %22 = tpu.matmul %20, %21, %cst_12 {dimension_numbers = #tpu.dot_dimension_numbers<[2], [2], [1], [1], [0, 0, 0, 1, 1, 1], [0], [0]>} : vector<2x8x128xbf16>, vector<2x8x128xbf16>, vector<2x8x8xf32> -> vector<2x8x8xf32>
    %cst_13 = arith.constant 1.250000e-01 : f32
    %23 = vector.broadcast %cst_13 : f32 to vector<2x8x8xf32>
    %24 = arith.mulf %22, %23 : vector<2x8x8xf32>
    %25 = vector.broadcast %4 : vector<2x1x8xf32> to vector<2x8x8xf32>
    %26 = arith.addf %24, %25 : vector<2x8x8xf32>
    %cst_14 = arith.constant dense<0xFF800000> : vector<2x8xf32>
    %27 = vector.multi_reduction <maximumf>, %26, %cst_14 [2] : vector<2x8x8xf32> to vector<2x8xf32>
    %28 = vector.shape_cast %27 : vector<2x8xf32> to vector<2x8x1xf32>
    %29 = vector.broadcast %28 : vector<2x8x1xf32> to vector<2x8x8xf32>
    %30 = arith.subf %26, %29 : vector<2x8x8xf32>
    %31 = math.exp %30 : vector<2x8x8xf32>
    %cst_15 = arith.constant dense<0.000000e+00> : vector<2x8xf32>
    %32 = vector.multi_reduction <add>, %31, %cst_15 [2] : vector<2x8x8xf32> to vector<2x8xf32>
    %33 = vector.shape_cast %32 : vector<2x8xf32> to vector<2x8x1xf32>
    %34 = tpu.reciprocal %33 {approx = true} : vector<2x8x1xf32> -> vector<2x8x1xf32>
    %35 = vector.broadcast %34 : vector<2x8x1xf32> to vector<2x8x8xf32>
    %36 = arith.mulf %31, %35 : vector<2x8x8xf32>
    %37 = arith.truncf %36 : vector<2x8x8xf32> to vector<2x8x8xbf16>
    %38 = arith.truncf %19 : vector<2x8x128xf32> to vector<2x8x128xbf16>
    %cst_16 = arith.constant dense<0.000000e+00> : vector<2x8x128xf32>
    %39 = tpu.matmul %37, %38, %cst_16 {dimension_numbers = #tpu.dot_dimension_numbers<[2], [1], [1], [2], [0, 0, 0, 1, 1, 2], [0], [0]>} : vector<2x8x8xbf16>, vector<2x8x128xbf16>, vector<2x8x128xf32> -> vector<2x8x128xf32>
    %40 = vector.shape_cast %39 : vector<2x8x128xf32> to vector<16x128xf32>
    %41 = arith.truncf %40 : vector<16x128xf32> to vector<16x128xbf16>
    %c0_17 = arith.constant 0 : index
    %c0_18 = arith.constant 0 : index
    %c0_19 = arith.constant 0 : index
    %c0_20 = arith.constant 0 : index
    %42 = vector.load %arg7[%c0_17, %c0_18, %c0_19, %c0_20] : memref<1x2x128x128xbf16, #tpu.memory_space<vmem>>, vector<1x1x128x128xbf16>
    %43 = vector.shape_cast %42 : vector<1x1x128x128xbf16> to vector<128x128xbf16>
    %cst_21 = arith.constant dense<0.000000e+00> : vector<16x128xf32>
    %44 = tpu.matmul %41, %43, %cst_21 {dimension_numbers = #tpu.dot_dimension_numbers<[1], [0], [0], [1], [0, 0, 1, 1], [], []>} : vector<16x128xbf16>, vector<128x128xbf16>, vector<16x128xf32> -> vector<16x128xf32>
    %45 = arith.addf %13, %44 : vector<16x128xf32>
    %46 = vector.extract_strided_slice %12 {offsets = [0, 384], sizes = [16, 128], strides = [1, 1]} : vector<16x768xf32> to vector<16x128xf32>
    %47 = vector.shape_cast %46 : vector<16x128xf32> to vector<2x8x128xf32>
    %48 = vector.extract_strided_slice %12 {offsets = [0, 512], sizes = [16, 128], strides = [1, 1]} : vector<16x768xf32> to vector<16x128xf32>
    %49 = vector.shape_cast %48 : vector<16x128xf32> to vector<2x8x128xf32>
    %50 = vector.extract_strided_slice %12 {offsets = [0, 640], sizes = [16, 128], strides = [1, 1]} : vector<16x768xf32> to vector<16x128xf32>
    %51 = vector.shape_cast %50 : vector<16x128xf32> to vector<2x8x128xf32>
    %52 = arith.truncf %47 : vector<2x8x128xf32> to vector<2x8x128xbf16>
    %53 = arith.truncf %49 : vector<2x8x128xf32> to vector<2x8x128xbf16>
    %cst_22 = arith.constant dense<0.000000e+00> : vector<2x8x8xf32>
    %54 = tpu.matmul %52, %53, %cst_22 {dimension_numbers = #tpu.dot_dimension_numbers<[2], [2], [1], [1], [0, 0, 0, 1, 1, 1], [0], [0]>} : vector<2x8x128xbf16>, vector<2x8x128xbf16>, vector<2x8x8xf32> -> vector<2x8x8xf32>
    %cst_23 = arith.constant 1.250000e-01 : f32
    %55 = vector.broadcast %cst_23 : f32 to vector<2x8x8xf32>
    %56 = arith.mulf %54, %55 : vector<2x8x8xf32>
    %57 = vector.broadcast %4 : vector<2x1x8xf32> to vector<2x8x8xf32>
    %58 = arith.addf %56, %57 : vector<2x8x8xf32>
    %cst_24 = arith.constant dense<0xFF800000> : vector<2x8xf32>
    %59 = vector.multi_reduction <maximumf>, %58, %cst_24 [2] : vector<2x8x8xf32> to vector<2x8xf32>
    %60 = vector.shape_cast %59 : vector<2x8xf32> to vector<2x8x1xf32>
    %61 = vector.broadcast %60 : vector<2x8x1xf32> to vector<2x8x8xf32>
    %62 = arith.subf %58, %61 : vector<2x8x8xf32>
    %63 = math.exp %62 : vector<2x8x8xf32>
    %cst_25 = arith.constant dense<0.000000e+00> : vector<2x8xf32>
    %64 = vector.multi_reduction <add>, %63, %cst_25 [2] : vector<2x8x8xf32> to vector<2x8xf32>
    %65 = vector.shape_cast %64 : vector<2x8xf32> to vector<2x8x1xf32>
    %66 = tpu.reciprocal %65 {approx = true} : vector<2x8x1xf32> -> vector<2x8x1xf32>
    %67 = vector.broadcast %66 : vector<2x8x1xf32> to vector<2x8x8xf32>
    %68 = arith.mulf %63, %67 : vector<2x8x8xf32>
    %69 = arith.truncf %68 : vector<2x8x8xf32> to vector<2x8x8xbf16>
    %70 = arith.truncf %51 : vector<2x8x128xf32> to vector<2x8x128xbf16>
    %cst_26 = arith.constant dense<0.000000e+00> : vector<2x8x128xf32>
    %71 = tpu.matmul %69, %70, %cst_26 {dimension_numbers = #tpu.dot_dimension_numbers<[2], [1], [1], [2], [0, 0, 0, 1, 1, 2], [0], [0]>} : vector<2x8x8xbf16>, vector<2x8x128xbf16>, vector<2x8x128xf32> -> vector<2x8x128xf32>
    %72 = vector.shape_cast %71 : vector<2x8x128xf32> to vector<16x128xf32>
    %73 = arith.truncf %72 : vector<16x128xf32> to vector<16x128xbf16>
    %c0_27 = arith.constant 0 : index
    %c1 = arith.constant 1 : index
    %c0_28 = arith.constant 0 : index
    %c0_29 = arith.constant 0 : index
    %74 = vector.load %arg7[%c0_27, %c1, %c0_28, %c0_29] : memref<1x2x128x128xbf16, #tpu.memory_space<vmem>>, vector<1x1x128x128xbf16>
    %75 = vector.shape_cast %74 : vector<1x1x128x128xbf16> to vector<128x128xbf16>
    %cst_30 = arith.constant dense<0.000000e+00> : vector<16x128xf32>
    %76 = tpu.matmul %73, %75, %cst_30 {dimension_numbers = #tpu.dot_dimension_numbers<[1], [0], [0], [1], [0, 0, 1, 1], [], []>} : vector<16x128xbf16>, vector<128x128xbf16>, vector<16x128xf32> -> vector<16x128xf32>
    %77 = arith.addf %45, %76 : vector<16x128xf32>
    %c0_31 = arith.constant 0 : index
    %c0_32 = arith.constant 0 : index
    %c0_33 = arith.constant 0 : index
    %78 = vector.load %arg8[%c0_31, %c0_32, %c0_33] : memref<1x1x128xf32, #tpu.memory_space<vmem>>, vector<1x1x128xf32>
    %79 = vector.shape_cast %78 : vector<1x1x128xf32> to vector<1x128xf32>
    %80 = vector.broadcast %79 : vector<1x128xf32> to vector<16x128xf32>
    %81 = arith.addf %77, %80 : vector<16x128xf32>
    %82 = arith.addf %3, %81 : vector<16x128xf32>
    %c0_34 = arith.constant 0 : index
    %c0_35 = arith.constant 0 : index
    %c0_36 = arith.constant 0 : index
    %83 = vector.load %arg9[%c0_34, %c0_35, %c0_36] : memref<1x1x128xf32, #tpu.memory_space<vmem>>, vector<1x1x128xf32>
    %84 = vector.shape_cast %83 : vector<1x1x128xf32> to vector<1x128xf32>
    %c0_37 = arith.constant 0 : index
    %c0_38 = arith.constant 0 : index
    %c0_39 = arith.constant 0 : index
    %85 = vector.load %arg10[%c0_37, %c0_38, %c0_39] : memref<1x1x128xf32, #tpu.memory_space<vmem>>, vector<1x1x128xf32>
    %86 = vector.shape_cast %85 : vector<1x1x128xf32> to vector<1x128xf32>
    %cst_40 = arith.constant dense<0.000000e+00> : vector<16xf32>
    %87 = vector.multi_reduction <add>, %82, %cst_40 [1] : vector<16x128xf32> to vector<16xf32>
    %88 = vector.shape_cast %87 : vector<16xf32> to vector<16x1xf32>
    %cst_41 = arith.constant 1.280000e+02 : f32
    %89 = vector.broadcast %cst_41 : f32 to vector<16x1xf32>
    %90 = arith.divf %88, %89 : vector<16x1xf32>
    %91 = vector.broadcast %90 : vector<16x1xf32> to vector<16x128xf32>
    %92 = arith.subf %82, %91 : vector<16x128xf32>
    %93 = vector.broadcast %90 : vector<16x1xf32> to vector<16x128xf32>
    %94 = arith.subf %82, %93 : vector<16x128xf32>
    %95 = arith.mulf %92, %94 : vector<16x128xf32>
    %cst_42 = arith.constant dense<0.000000e+00> : vector<16xf32>
    %96 = vector.multi_reduction <add>, %95, %cst_42 [1] : vector<16x128xf32> to vector<16xf32>
    %97 = vector.shape_cast %96 : vector<16xf32> to vector<16x1xf32>
    %cst_43 = arith.constant 1.280000e+02 : f32
    %98 = vector.broadcast %cst_43 : f32 to vector<16x1xf32>
    %99 = arith.divf %97, %98 : vector<16x1xf32>
    %100 = vector.broadcast %90 : vector<16x1xf32> to vector<16x128xf32>
    %101 = arith.subf %82, %100 : vector<16x128xf32>
    %cst_44 = arith.constant 9.99999996E-13 : f32
    %102 = vector.broadcast %cst_44 : f32 to vector<16x1xf32>
    %103 = arith.addf %99, %102 : vector<16x1xf32>
    %104 = math.rsqrt %103 : vector<16x1xf32>
    %105 = vector.broadcast %104 : vector<16x1xf32> to vector<16x128xf32>
    %106 = arith.mulf %101, %105 : vector<16x128xf32>
    %107 = vector.broadcast %84 : vector<1x128xf32> to vector<16x128xf32>
    %108 = arith.mulf %106, %107 : vector<16x128xf32>
    %109 = vector.broadcast %86 : vector<1x128xf32> to vector<16x128xf32>
    %110 = arith.addf %108, %109 : vector<16x128xf32>
    %111 = arith.truncf %110 : vector<16x128xf32> to vector<16x128xbf16>
    %c0_45 = arith.constant 0 : index
    %c0_46 = arith.constant 0 : index
    %c0_47 = arith.constant 0 : index
    %112 = vector.load %arg11[%c0_45, %c0_46, %c0_47] : memref<1x128x256xbf16, #tpu.memory_space<vmem>>, vector<1x128x256xbf16>
    %113 = vector.shape_cast %112 : vector<1x128x256xbf16> to vector<128x256xbf16>
    %cst_48 = arith.constant dense<0.000000e+00> : vector<16x256xf32>
    %114 = tpu.matmul %111, %113, %cst_48 {dimension_numbers = #tpu.dot_dimension_numbers<[1], [0], [0], [1], [0, 0, 1, 1], [], []>} : vector<16x128xbf16>, vector<128x256xbf16>, vector<16x256xf32> -> vector<16x256xf32>
    %c0_49 = arith.constant 0 : index
    %c0_50 = arith.constant 0 : index
    %c0_51 = arith.constant 0 : index
    %115 = vector.load %arg12[%c0_49, %c0_50, %c0_51] : memref<1x1x256xf32, #tpu.memory_space<vmem>>, vector<1x1x256xf32>
    %116 = vector.shape_cast %115 : vector<1x1x256xf32> to vector<1x256xf32>
    %117 = vector.broadcast %116 : vector<1x256xf32> to vector<16x256xf32>
    %118 = arith.addf %114, %117 : vector<16x256xf32>
    %cst_52 = arith.constant 5.000000e-01 : f32
    %119 = vector.broadcast %cst_52 : f32 to vector<16x256xf32>
    %120 = arith.mulf %119, %118 : vector<16x256xf32>
    %cst_53 = arith.constant 4.471500e-02 : f32
    %121 = vector.broadcast %cst_53 : f32 to vector<16x256xf32>
    %122 = arith.mulf %121, %118 : vector<16x256xf32>
    %123 = arith.mulf %122, %118 : vector<16x256xf32>
    %124 = arith.mulf %123, %118 : vector<16x256xf32>
    %125 = arith.addf %118, %124 : vector<16x256xf32>
    %cst_54 = arith.constant 0.797884583 : f32
    %126 = vector.broadcast %cst_54 : f32 to vector<16x256xf32>
    %127 = arith.mulf %126, %125 : vector<16x256xf32>
    %128 = math.tanh %127 : vector<16x256xf32>
    %cst_55 = arith.constant 1.000000e+00 : f32
    %129 = vector.broadcast %cst_55 : f32 to vector<16x256xf32>
    %130 = arith.addf %129, %128 : vector<16x256xf32>
    %131 = arith.mulf %120, %130 : vector<16x256xf32>
    %132 = arith.truncf %131 : vector<16x256xf32> to vector<16x256xbf16>
    %c0_56 = arith.constant 0 : index
    %c0_57 = arith.constant 0 : index
    %c0_58 = arith.constant 0 : index
    %133 = vector.load %arg13[%c0_56, %c0_57, %c0_58] : memref<1x256x128xbf16, #tpu.memory_space<vmem>>, vector<1x256x128xbf16>
    %134 = vector.shape_cast %133 : vector<1x256x128xbf16> to vector<256x128xbf16>
    %cst_59 = arith.constant dense<0.000000e+00> : vector<16x128xf32>
    %135 = tpu.matmul %132, %134, %cst_59 {dimension_numbers = #tpu.dot_dimension_numbers<[1], [0], [0], [1], [0, 0, 1, 1], [], []>} : vector<16x256xbf16>, vector<256x128xbf16>, vector<16x128xf32> -> vector<16x128xf32>
    %c0_60 = arith.constant 0 : index
    %c0_61 = arith.constant 0 : index
    %c0_62 = arith.constant 0 : index
    %136 = vector.load %arg14[%c0_60, %c0_61, %c0_62] : memref<1x1x128xf32, #tpu.memory_space<vmem>>, vector<1x1x128xf32>
    %137 = vector.shape_cast %136 : vector<1x1x128xf32> to vector<1x128xf32>
    %138 = vector.broadcast %137 : vector<1x128xf32> to vector<16x128xf32>
    %139 = arith.addf %135, %138 : vector<16x128xf32>
    %140 = arith.addf %110, %139 : vector<16x128xf32>
    %c0_63 = arith.constant 0 : index
    %c0_64 = arith.constant 0 : index
    %c0_65 = arith.constant 0 : index
    %141 = vector.load %arg15[%c0_63, %c0_64, %c0_65] : memref<1x1x128xf32, #tpu.memory_space<vmem>>, vector<1x1x128xf32>
    %142 = vector.shape_cast %141 : vector<1x1x128xf32> to vector<1x128xf32>
    %c0_66 = arith.constant 0 : index
    %c0_67 = arith.constant 0 : index
    %c0_68 = arith.constant 0 : index
    %143 = vector.load %arg16[%c0_66, %c0_67, %c0_68] : memref<1x1x128xf32, #tpu.memory_space<vmem>>, vector<1x1x128xf32>
    %144 = vector.shape_cast %143 : vector<1x1x128xf32> to vector<1x128xf32>
    %cst_69 = arith.constant dense<0.000000e+00> : vector<16xf32>
    %145 = vector.multi_reduction <add>, %140, %cst_69 [1] : vector<16x128xf32> to vector<16xf32>
    %146 = vector.shape_cast %145 : vector<16xf32> to vector<16x1xf32>
    %cst_70 = arith.constant 1.280000e+02 : f32
    %147 = vector.broadcast %cst_70 : f32 to vector<16x1xf32>
    %148 = arith.divf %146, %147 : vector<16x1xf32>
    %149 = vector.broadcast %148 : vector<16x1xf32> to vector<16x128xf32>
    %150 = arith.subf %140, %149 : vector<16x128xf32>
    %151 = vector.broadcast %148 : vector<16x1xf32> to vector<16x128xf32>
    %152 = arith.subf %140, %151 : vector<16x128xf32>
    %153 = arith.mulf %150, %152 : vector<16x128xf32>
    %cst_71 = arith.constant dense<0.000000e+00> : vector<16xf32>
    %154 = vector.multi_reduction <add>, %153, %cst_71 [1] : vector<16x128xf32> to vector<16xf32>
    %155 = vector.shape_cast %154 : vector<16xf32> to vector<16x1xf32>
    %cst_72 = arith.constant 1.280000e+02 : f32
    %156 = vector.broadcast %cst_72 : f32 to vector<16x1xf32>
    %157 = arith.divf %155, %156 : vector<16x1xf32>
    %158 = vector.broadcast %148 : vector<16x1xf32> to vector<16x128xf32>
    %159 = arith.subf %140, %158 : vector<16x128xf32>
    %cst_73 = arith.constant 9.99999996E-13 : f32
    %160 = vector.broadcast %cst_73 : f32 to vector<16x1xf32>
    %161 = arith.addf %157, %160 : vector<16x1xf32>
    %162 = math.rsqrt %161 : vector<16x1xf32>
    %163 = vector.broadcast %162 : vector<16x1xf32> to vector<16x128xf32>
    %164 = arith.mulf %159, %163 : vector<16x128xf32>
    %165 = vector.broadcast %142 : vector<1x128xf32> to vector<16x128xf32>
    %166 = arith.mulf %164, %165 : vector<16x128xf32>
    %167 = vector.broadcast %144 : vector<1x128xf32> to vector<16x128xf32>
    %168 = arith.addf %166, %167 : vector<16x128xf32>
    %c0_74 = arith.constant 0 : index
    %c0_75 = arith.constant 0 : index
    %169 = vector.load %arg22[%c0_74, %c0_75] : memref<16x128xf32, #tpu.memory_space<vmem>>, vector<16x128xf32>
    tpu.vector_store %arg22[%c0_74, %c0_75], %168 {strides = array<i32>} : memref<16x128xf32, #tpu.memory_space<vmem>>, vector<16x128xf32>,
    %c1_i32 = arith.constant 1 : i32
    %170 = arith.cmpi eq, %arg0, %c1_i32 : i32
    %171 = arith.extui %170 : i1 to i32
    %c0_i32_76 = arith.constant 0 : i32
    %172 = arith.cmpi ne, %171, %c0_i32_76 : i32
    scf.if %172 {
      %173 = vector.shape_cast %168 : vector<16x128xf32> to vector<2x8x128xf32>
      %174 = vector.extract_strided_slice %173 {offsets = [0, 0, 0], sizes = [2, 1, 128], strides = [1, 1, 1]} : vector<2x8x128xf32> to vector<2x1x128xf32>
      %175 = vector.shape_cast %174 : vector<2x1x128xf32> to vector<2x128xf32>
      %176 = arith.truncf %175 : vector<2x128xf32> to vector<2x128xbf16>
      %c0_77 = arith.constant 0 : index
      %c0_78 = arith.constant 0 : index
      %177 = vector.load %arg17[%c0_77, %c0_78] : memref<128x128xbf16, #tpu.memory_space<vmem>>, vector<128x128xbf16>
      %cst_79 = arith.constant dense<0.000000e+00> : vector<2x128xf32>
      %178 = tpu.matmul %176, %177, %cst_79 {dimension_numbers = #tpu.dot_dimension_numbers<[1], [0], [0], [1], [0, 0, 1, 1], [], []>} : vector<2x128xbf16>, vector<128x128xbf16>, vector<2x128xf32> -> vector<2x128xf32>
      %c0_80 = arith.constant 0 : index
      %c0_81 = arith.constant 0 : index
      %179 = vector.load %arg18[%c0_80, %c0_81] : memref<1x128xf32, #tpu.memory_space<vmem>>, vector<1x128xf32>
      %180 = vector.broadcast %179 : vector<1x128xf32> to vector<2x128xf32>
      %181 = arith.addf %178, %180 : vector<2x128xf32>
      %182 = math.tanh %181 : vector<2x128xf32>
      %183 = arith.truncf %182 : vector<2x128xf32> to vector<2x128xbf16>
      %c0_82 = arith.constant 0 : index
      %c0_83 = arith.constant 0 : index
      %184 = vector.load %arg19[%c0_82, %c0_83] : memref<128x128xbf16, #tpu.memory_space<vmem>>, vector<128x128xbf16>
      %cst_84 = arith.constant dense<0.000000e+00> : vector<2x128xf32>
      %185 = tpu.matmul %183, %184, %cst_84 {dimension_numbers = #tpu.dot_dimension_numbers<[1], [0], [0], [1], [0, 0, 1, 1], [], []>} : vector<2x128xbf16>, vector<128x128xbf16>, vector<2x128xf32> -> vector<2x128xf32>
      %c0_85 = arith.constant 0 : index
      %c0_86 = arith.constant 0 : index
      %186 = vector.load %arg20[%c0_85, %c0_86] : memref<1x128xf32, #tpu.memory_space<vmem>>, vector<1x128xf32>
      %187 = vector.broadcast %186 : vector<1x128xf32> to vector<2x128xf32>
      %188 = arith.addf %185, %187 : vector<2x128xf32>
      %c0_87 = arith.constant 0 : index
      %c0_88 = arith.constant 0 : index
      %189 = vector.load %arg21[%c0_87, %c0_88] : memref<2x128xf32, #tpu.memory_space<vmem>>, vector<2x128xf32>
      tpu.vector_store %arg21[%c0_87, %c0_88], %188 {strides = array<i32>} : memref<2x128xf32, #tpu.memory_space<vmem>>, vector<2x128xf32>,
    } else {
    }
    return
  }
  func.func @transform_0(%arg0: i32) -> (i32, i32) {
    %c0_i32 = arith.constant 0 : i32
    %c0_i32_0 = arith.constant 0 : i32
    %c0_i32_1 = arith.constant 0 : i32
    return %c0_i32, %c0_i32_0 : i32, i32
  }
  func.func @transform_1(%arg0: i32) -> (i32, i32, i32) {
    %c0_i32 = arith.constant 0 : i32
    %c0_i32_0 = arith.constant 0 : i32
    %c0_i32_1 = arith.constant 0 : i32
    %c0_i32_2 = arith.constant 0 : i32
    return %c0_i32, %c0_i32_0, %c0_i32_1 : i32, i32, i32
  }
  func.func @transform_2(%arg0: i32) -> (i32, i32) {
    %c0_i32 = arith.constant 0 : i32
    %c0_i32_0 = arith.constant 0 : i32
    %c0_i32_1 = arith.constant 0 : i32
    return %c0_i32, %c0_i32_0 : i32, i32
  }
  func.func @transform_3(%arg0: i32) -> (i32, i32) {
    %c0_i32 = arith.constant 0 : i32
    %c0_i32_0 = arith.constant 0 : i32
    %c0_i32_1 = arith.constant 0 : i32
    return %c0_i32, %c0_i32_0 : i32, i32
  }
  func.func @transform_4(%arg0: i32) -> (i32, i32, i32) {
    %c0_i32 = arith.constant 0 : i32
    %c0_i32_0 = arith.constant 0 : i32
    %c0_i32_1 = arith.constant 0 : i32
    return %arg0, %c0_i32, %c0_i32_0 : i32, i32, i32
  }
  func.func @transform_5(%arg0: i32) -> (i32, i32, i32) {
    %c0_i32 = arith.constant 0 : i32
    %c0_i32_0 = arith.constant 0 : i32
    %c0_i32_1 = arith.constant 0 : i32
    return %arg0, %c0_i32, %c0_i32_0 : i32, i32, i32
  }
  func.func @transform_6(%arg0: i32) -> (i32, i32, i32, i32) {
    %c0_i32 = arith.constant 0 : i32
    %c0_i32_0 = arith.constant 0 : i32
    %c0_i32_1 = arith.constant 0 : i32
    %c0_i32_2 = arith.constant 0 : i32
    return %arg0, %c0_i32, %c0_i32_0, %c0_i32_1 : i32, i32, i32, i32
  }
  func.func @transform_7(%arg0: i32) -> (i32, i32, i32) {
    %c0_i32 = arith.constant 0 : i32
    %c0_i32_0 = arith.constant 0 : i32
    %c0_i32_1 = arith.constant 0 : i32
    return %arg0, %c0_i32, %c0_i32_0 : i32, i32, i32
  }
  func.func @transform_8(%arg0: i32) -> (i32, i32, i32) {
    %c0_i32 = arith.constant 0 : i32
    %c0_i32_0 = arith.constant 0 : i32
    %c0_i32_1 = arith.constant 0 : i32
    return %arg0, %c0_i32, %c0_i32_0 : i32, i32, i32
  }
  func.func @transform_9(%arg0: i32) -> (i32, i32, i32) {
    %c0_i32 = arith.constant 0 : i32
    %c0_i32_0 = arith.constant 0 : i32
    %c0_i32_1 = arith.constant 0 : i32
    return %arg0, %c0_i32, %c0_i32_0 : i32, i32, i32
  }
  func.func @transform_10(%arg0: i32) -> (i32, i32, i32) {
    %c0_i32 = arith.constant 0 : i32
    %c0_i32_0 = arith.constant 0 : i32
    %c0_i32_1 = arith.constant 0 : i32
    return %arg0, %c0_i32, %c0_i32_0 : i32, i32, i32
  }
  func.func @transform_11(%arg0: i32) -> (i32, i32, i32) {
    %c0_i32 = arith.constant 0 : i32
    %c0_i32_0 = arith.constant 0 : i32
    %c0_i32_1 = arith.constant 0 : i32
    return %arg0, %c0_i32, %c0_i32_0 : i32, i32, i32
  }
  func.func @transform_12(%arg0: i32) -> (i32, i32, i32) {
    %c0_i32 = arith.constant 0 : i32
    %c0_i32_0 = arith.constant 0 : i32
    %c0_i32_1 = arith.constant 0 : i32
    return %arg0, %c0_i32, %c0_i32_0 : i32, i32, i32
  }
  func.func @transform_13(%arg0: i32) -> (i32, i32, i32) {
    %c0_i32 = arith.constant 0 : i32
    %c0_i32_0 = arith.constant 0 : i32
    %c0_i32_1 = arith.constant 0 : i32
    return %arg0, %c0_i32, %c0_i32_0 : i32, i32, i32
  }
  func.func @transform_14(%arg0: i32) -> (i32, i32, i32) {
    %c0_i32 = arith.constant 0 : i32
    %c0_i32_0 = arith.constant 0 : i32
    %c0_i32_1 = arith.constant 0 : i32
    return %arg0, %c0_i32, %c0_i32_0 : i32, i32, i32
  }
  func.func @transform_15(%arg0: i32) -> (i32, i32, i32) {
    %c0_i32 = arith.constant 0 : i32
    %c0_i32_0 = arith.constant 0 : i32
    %c0_i32_1 = arith.constant 0 : i32
    return %arg0, %c0_i32, %c0_i32_0 : i32, i32, i32
  }
  func.func @transform_16(%arg0: i32) -> (i32, i32) {
    %c0_i32 = arith.constant 0 : i32
    %c0_i32_0 = arith.constant 0 : i32
    %c0_i32_1 = arith.constant 0 : i32
    return %c0_i32, %c0_i32_0 : i32, i32
  }
  func.func @transform_17(%arg0: i32) -> (i32, i32) {
    %c0_i32 = arith.constant 0 : i32
    %c0_i32_0 = arith.constant 0 : i32
    %c0_i32_1 = arith.constant 0 : i32
    return %c0_i32, %c0_i32_0 : i32, i32
  }
  func.func @transform_18(%arg0: i32) -> (i32, i32) {
    %c0_i32 = arith.constant 0 : i32
    %c0_i32_0 = arith.constant 0 : i32
    %c0_i32_1 = arith.constant 0 : i32
    return %c0_i32, %c0_i32_0 : i32, i32
  }
  func.func @transform_19(%arg0: i32) -> (i32, i32) {
    %c0_i32 = arith.constant 0 : i32
    %c0_i32_0 = arith.constant 0 : i32
    %c0_i32_1 = arith.constant 0 : i32
    return %c0_i32, %c0_i32_0 : i32, i32
  }
  func.func @transform_20(%arg0: i32) -> (i32, i32) {
    %c0_i32 = arith.constant 0 : i32
    %c0_i32_0 = arith.constant 0 : i32
    %c0_i32_1 = arith.constant 0 : i32
    return %c0_i32, %c0_i32_0 : i32, i32
  }
}

</mosaic_0001>

<bundles_post_ra>
// kernel: tpu_custom_call.1
= control target key start
LH: loop header
LB: loop body
LE: loop exit
PB: predicated region body
PF: predicated region fallthrough
CT: control target
= control target key end

     0   :  { %s5573_s0 = inlined_call_operand.hbm [shape: f32[16,128], index: 0, kind: input, shape index: {}]   ;;  %s5574_s1 = inlined_call_operand.hbm [shape: f32[2,1,8], index: 1, kind: input, shape index: {}]   ;;  %s5575_s2 = inlined_call_operand.hbm [shape: f32[1,128], index: 2, kind: input, shape index: {}]   ;;  %s5576_s3 = inlined_call_operand.hbm [shape: f32[1,128], index: 3, kind: input, shape index: {}]   ;;  %s5577_s4 = inlined_call_operand.hbm [shape: bf16[2,128,768], index: 4, kind: input, shape index: {}]   ;;  %s5578_s5 = inlined_call_operand.hbm [shape: f32[2,1,768], index: 5, kind: input, shape index: {}]   ;;  %s5579_s6 = inlined_call_operand.hbm [shape: bf16[2,2,128,128], index: 6, kind: input, shape index: {}]   ;;  %s5580_s7 = inlined_call_operand.hbm [shape: f32[2,1,128], index: 7, kind: input, shape index: {}]   ;;  %s5581_s8 = inlined_call_operand.hbm [shape: f32[2,1,128], index: 8, kind: input, shape index: {}]   ;;  %s5582_s9 = inlined_call_operand.hbm [shape: f32[2,1,128], index: 9, kind: input, shape index: {}]   ;;  %s5583_s10 = inlined_call_operand.hbm [shape: bf16[2,128,256], index: 10, kind: input, shape index: {}]   ;;  %s5584_s11 = inlined_call_operand.vmem [shape: f32[2,1,256], index: 11, kind: input, shape index: {}]   ;;  %s5585_s12 = inlined_call_operand.hbm [shape: bf16[2,256,128], index: 12, kind: input, shape index: {}]   ;;  %s5586_s13 = inlined_call_operand.hbm [shape: f32[2,1,128], index: 13, kind: input, shape index: {}]   ;;  %s5587_s14 = inlined_call_operand.hbm [shape: f32[2,1,128], index: 14, kind: input, shape index: {}]   ;;  %s5588_s15 = inlined_call_operand.hbm [shape: f32[2,1,128], index: 15, kind: input, shape index: {}]   ;;  %s5589_s16 = inlined_call_operand.hbm [shape: bf16[128,128], index: 16, kind: input, shape index: {}]   ;;  %s5590_s17 = inlined_call_operand.hbm [shape: f32[1,128], index: 17, kind: input, shape index: {}]   ;;  %s5591_s18 = inlined_call_operand.vmem [shape: bf16[128,128], index: 18, kind: input, shape index: {}]   ;;  %s5592_s19 = inlined_call_operand.vmem [shape: f32[1,128], index: 19, kind: input, shape index: {}]   ;;  %s5593_s20 = inlined_call_operand.hbm [shape: f32[2,128], index: 20, kind: output, shape index: {}]  }
   0x1   :  { %5636 = sst [smem:[#allocation39_spill]] %s5573_s0 }
   0x2   :  { %5637 = sst [smem:[#allocation40_spill]] %s5574_s1 }
   0x3   :  { %5638 = sst [smem:[#allocation41_spill]] %s5575_s2 }
   0x4   :  { %5639 = sst [smem:[#allocation42_spill]] %s5576_s3 }
   0x5   :  { %5640 = sst [smem:[#allocation43_spill]] %s5577_s4 }
   0x6   :  { %5641 = sst [smem:[#allocation44_spill]] %s5578_s5 }
   0x7   :  { %5642 = sst [smem:[#allocation45_spill]] %s5579_s6 }
   0x8   :  { %5643 = sst [smem:[#allocation46_spill]] %s5580_s7 }
   0x9   :  { %5644 = sst [smem:[#allocation47_spill]] %s5581_s8 }
   0xa   :  { %5645 = sst [smem:[#allocation48_spill]] %s5582_s9 }
   0xb   :  { %5646 = sst [smem:[#allocation49_spill]] %s5583_s10 }
   0xc   :  { %5647 = sst [smem:[#allocation50_spill]] %s5584_s11 }
   0xd   :  { %5648 = sst [smem:[#allocation51_spill]] %s5585_s12 }
   0xe   :  { %5649 = sst [smem:[#allocation52_spill]] %s5587_s14 }
   0xf   :  { %5650 = sst [smem:[#allocation53_spill]] %s5588_s15 }
  0x10   :  { %5651 = sst [smem:[#allocation54_spill]] %s5589_s16 }
  0x11   :  { %5652 = sst [smem:[#allocation55_spill]] %s5590_s17 }
  0x12   :  { %5653 = sst [smem:[#allocation56_spill]] %s5591_s18 }
  0x13   :  { %5654 = sst [smem:[#allocation57_spill]] %s5592_s19 }
  0x14   :  { %5655 = sst [smem:[#allocation58_spill]] %s5593_s20 }
  0x15   :  { %25 = vsyncpa [#allocation4], 0 }
  0x16   :  { %26 = vsyncpa [#allocation7], 0 }
  0x17   :  { %27 = vsyncpa [#allocation10], 0 }
  0x18   :  { %28 = vsyncpa [#allocation5], 0  ;;  %s4685_s1 = smov 0   ;;  %s4687_s22 = smov 0  }
  0x19   :  { %s4689_s23 = smov 0   ;;  %s4691_s24 = smov 0  }
  0x1a LB: > { %5656 = sst [smem:[#allocation32_spill]] %s4539_s22  ;;  %s4704_s2 = sadd.s32 4294967295, %s4547_s24   ;;  %s4547_s24 = sphi %s4691_s24, %s5731_s24   ;;  %s4543_s23 = sphi %s4689_s23, %s5734_s23   ;;  %s4539_s22 = sphi %s4687_s22, %s5733_s22   ;;  %s4535_s1 = sphi %s4685_s1, %s5732_s1  }
  0x1b   : > { %5657 = sst [smem:[#allocation33_spill]] %s4543_s23  ;;  %s4707_s25 = sadd.s32 1, %s4547_s24  }
  0x1c   : > { %5658 = sst [smem:[#allocation34_spill]] %s4704_s2  ;;  %s122_s3 = ssub.s32 %s4547_s24, %s4707_s25 }
  0x1d   : > { %5659 = sst [smem:[#allocation35_spill]] %s4707_s25  ;;  %s125_s26 = sadd.s32 1, %s4543_s23 }
  0x1e   : > { %p123_p0 = scmp.eq.s32.totalorder %s122_s3, 0  ;;  %p132_p1 = scmp.ne.s32.totalorder %s4543_s23, %s4539_s22 }
  0x1f   : > { %p133_p2 = scmp.eq.s32.totalorder %s4547_s24, 0  ;;  %p138_p3 = scmp.ne.s32.totalorder %s4539_s22, %s4535_s1 }
  0x20   : > { %s4717_s27 = scalar_select %p123_p0, %s4543_s23, %s125_s26  }
  0x21   : > { %p4719_p4 = por %p133_p2, %p132_p1  ;;  %p5603_p5 = scmp.eq.s32.totalorder %s4704_s2, 0 }
  0x22   : > { %5660 = sst [smem:[#allocation36_spill]] %s4717_s27  ;;  %p3216_p6 = scmp.ge.s32.totalorder %s4547_s24, 1 }
  0x23   : > { %p540_p7 = scmp.lt.s32.totalorder %s4547_s24, 3  ;;  %p4728_p8 = por %p5603_p5, %p138_p3 }
  0x24   : > { %s4549_s30 = smov [#allocation3]   ;;  %p3722_p13 = scmp.lt.s32.totalorder %s4547_s24, 2 }
  0x25   : > { %s5662_s4 = scalar_select %p4728_p8, 1, 0 }
  0x26   : > { %p4733_p10 = pnand %p3216_p6, %p540_p7  ;;  %s552_s0 = sshll.u32 %s4549_s30, 4  ;;  %s553_s0 = int_to_ptr.vmem [resolvable:$true] %s552_s0 }
  0x27   : > { %5663 = sst [smem:[#allocation37_spill]] %s5662_s4  ;;  %s4748_s3 = sand.u32 1, %s4543_s23  }
  0x28   : > { %s5664_s29 = scalar_select %p4733_p10, 1, 0 }
  0x29   : > { %p3663_p11 = pneg %p4733_p10  ;;  %p4752_p0 = pnand %p3722_p13, %p4719_p4 }
  0x2a   : > { %5665 = sst [smem:[#allocation38_spill]] %s5664_s29  ;;  %s5668_s25 = sld [smem:[#allocation39_spill]] }
  0x2b   : > { %p4741_p12 = pnand %p3663_p11, %p5603_p5 }
  0x2c   : > { %s5667_s26 = scalar_select %p4752_p0, 1, 0 }
  0x2d   : > { %s5666_s21 = scalar_select %p4741_p12, 1, 0 }
  0x2e   : > { %p4764_p2 = pneg %p4741_p12 }
  0x30   : > { %s3965_s20 = scalar_lea.hbm %s5668_s25, 256 }
  0x31   : > { %p3966_p1 = scmp.ne.s32.totalorder %s5668_s25, %s3965_s20  ;;  %p3972_p6 = scmp.lt.u32.totalorder %s3965_s20, %s5668_s25 }
  0x32   : > { %s5669_s11 = scalar_select %p4764_p2, 1, 0 }
  0x33   : > { %p3968_p3 = pnand %p4764_p2, %p3966_p1 }
  0x35   : > { %p3969_p4 = pneg %p3968_p3 }
  0x37   : > { %p3974_p7 = pnand %p3972_p6, %p3969_p4 }
  0x39   : > { %3977 = shalt.err (!%p3974_p7)
}
  0x3a   : > { %s3978_s27 = scalar_lea.vmem %s553_s0, 256  ;;  %p3986_p5 = scmp.lt.s32.totalorder %s553_s0, %s553_s0 }
  0x3b   : > { %p3979_p11 = scmp.ne.s32.totalorder %s553_s0, %s3978_s27  ;;  %p3987_p8 = scmp.lt.s32.totalorder %s3978_s27, %s3978_s27 }
  0x3d   : > { %p3981_p13 = pnand %p3979_p11, %p4764_p2  ;;  %p3988_p10 = por %p3987_p8, %p3986_p5 }
  0x3f   : > { %p3982_p9 = pneg %p3981_p13 }
  0x41   : > { %p3989_p0 = pnand %p3988_p10, %p3982_p9 }
  0x43   : > { %3992 = shalt.err (!%p3989_p0)
}
  0x44   : > { %s5623_s18 = smov 128   ;;  %s5624_s19 = smov 8  }
  0x45   : > { %3666 = dma.hbm_to_vmem [thread:$0]  (!%p4741_p12), %s5668_s25, 256, %s553_s0, [#allocation4], %s5623_s18, %s5623_s18, %s5624_s19  }
  0x46   : > { %s3607_s30 = smul.u32 384, %s4748_s3  ;;  %s5670_s22 = sld [smem:[#allocation43_spill]] }
  0x47   : > { %s3608_s28 = smul.u32 6144, %s4547_s24  ;;  %s5672_s16 = sand.u32 1, %s4547_s24  }
  0x48   : > { %s3609_s27 = smul.u32 6, %s4748_s3  ;;  %s635_s17 = scalar_lea.vmem [#allocation11], %s3607_s30 }
  0x49   : > { %s642_s15 = sshll.u32 %s635_s17, 4  ;;  %s4795_s14 = scalar_lea.sflag [#allocation4], %s5672_s16  ;;  %s4791_s15 = int_to_ptr.vmem [resolvable:$true] %s642_s15 }
  0x4a   : > { %p5673_p8 = scmp.ne.s32.totalorder %s5667_s26, 0 }
  0x4c   : > { %s5671_s2 = smov %s5670_s22  ;;  %s4789_s29 = scalar_lea.hbm %s5670_s22, %s3608_s28 }
  0x4d   : > { %s3993_s0 = scalar_lea.hbm %s4789_s29, 6144  ;;  %p4801_p9 = pneg %p5673_p8 }
  0x4e   : > { %p3994_p5 = scmp.ne.s32.totalorder %s4789_s29, %s3993_s0  ;;  %s3998_s17 = scalar_lea.hbm %s5671_s2, 12288 }
  0x4f   : > { %s5674_s20 = scalar_select %p4801_p9, 1, 0 }
  0x50   : > { %p3996_p10 = pnand %p4801_p9, %p3994_p5  ;;  %p3999_p1 = scmp.lt.u32.totalorder %s4789_s29, %s5671_s2 }
  0x51   : > { %p4000_p3 = scmp.lt.u32.totalorder %s3998_s17, %s3993_s0  ;;  %p4002_p6 = scmp.lt.u32.totalorder %s3993_s0, %s4789_s29 }
  0x52   : > { %p3997_p0 = pneg %p3996_p10 }
  0x53   : > { %p4001_p4 = por %p4000_p3, %p3999_p1 }
  0x55   : > { %p4003_p7 = por %p4002_p6, %p4001_p4 }
  0x57   : > { %p4004_p11 = pnand %p4003_p7, %p3997_p0 }
  0x59   : > { %4007 = shalt.err (!%p4004_p11)
}
  0x5a   : > { %s4008_s16 = scalar_lea.vmem %s4791_s15, 6144  ;;  %s4552_s30 = smov [#allocation11]  }
  0x5b   : > { %p4009_p13 = scmp.ne.s32.totalorder %s4791_s15, %s4008_s16  ;;  %s4013_s28 = sshll.u32 %s4552_s30, 4  ;;  %s4014_s28 = int_to_ptr.vmem [resolvable:$false] %s4013_s28 }
  0x5c   : > { %s4015_s22 = scalar_lea.vmem %s4014_s28, 12288  ;;  %p4016_p12 = scmp.lt.s32.totalorder %s4791_s15, %s4014_s28 }
  0x5d   : > { %p4011_p5 = pnand %p4009_p13, %p4801_p9  ;;  %p4017_p2 = scmp.lt.s32.totalorder %s4015_s22, %s4008_s16 }
  0x5f   : > { %p4012_p10 = pneg %p4011_p5  ;;  %p4018_p1 = por %p4017_p2, %p4016_p12 }
  0x61   : > { %p4019_p3 = pnand %p4018_p1, %p4012_p10 }
  0x63   : > { %4022 = shalt.err (!%p4019_p3)
}
  0x64   : > { %s4553_s0 = smov 384   ;;  %s4554_s23 = smov 24  }
  0x65   : > { %3685 = dma.hbm_to_vmem [thread:$0]  (!%p5673_p8), %s4789_s29, 6144, %s4791_s15, %s4795_s14, %s4553_s0, %s4553_s0, %s4554_s23  }
  0x66   : > { %s3610_s17 = smul.u32 96, %s4547_s24  ;;  %s656_s4 = scalar_lea.vmem [#allocation12], %s3609_s27 }
  0x67   : > { %s664_s1 = sshll.u32 %s656_s4, 4  ;;  %s5675_s5 = sld [smem:[#allocation44_spill]]  ;;  %s665_s1 = int_to_ptr.vmem [resolvable:$true] %s664_s1 }
  0x6d   : > { %s662_s28 = scalar_lea.hbm %s5675_s5, %s3610_s17  ;;  %s4028_s2 = scalar_lea.hbm %s5675_s5, 192 }
  0x6e   : > { %s4023_s22 = scalar_lea.hbm %s662_s28, 96  ;;  %p4029_p4 = scmp.lt.u32.totalorder %s662_s28, %s5675_s5 }
  0x6f   : > { %p4024_p12 = scmp.ne.s32.totalorder %s662_s28, %s4023_s22  ;;  %p4030_p6 = scmp.lt.u32.totalorder %s4028_s2, %s4023_s22 }
  0x70   : > { %p4032_p11 = scmp.lt.u32.totalorder %s4023_s22, %s662_s28 }
  0x71   : > { %p4026_p2 = pnand %p4024_p12, %p4801_p9  ;;  %p4031_p7 = por %p4030_p6, %p4029_p4 }
  0x73   : > { %p4027_p0 = pneg %p4026_p2  ;;  %p4033_p13 = por %p4032_p11, %p4031_p7 }
  0x75   : > { %p4034_p5 = pnand %p4033_p13, %p4027_p0 }
  0x77   : > { %4037 = shalt.err (!%p4034_p5)
}
  0x78   : > { %s4038_s29 = scalar_lea.vmem %s665_s1, 96  ;;  %s4555_s27 = smov [#allocation12]  }
  0x79   : > { %p4039_p10 = scmp.ne.s32.totalorder %s665_s1, %s4038_s29  ;;  %s4043_s0 = sshll.u32 %s4555_s27, 4  ;;  %s4044_s0 = int_to_ptr.vmem [resolvable:$false] %s4043_s0 }
  0x7a   : > { %s4045_s18 = scalar_lea.vmem %s4044_s0, 192  ;;  %p4046_p12 = scmp.lt.s32.totalorder %s665_s1, %s4044_s0 }
  0x7b   : > { %p4041_p1 = pnand %p4039_p10, %p4801_p9  ;;  %p4047_p2 = scmp.lt.s32.totalorder %s4045_s18, %s4038_s29 }
  0x7d   : > { %p4042_p3 = pneg %p4041_p1  ;;  %p4048_p8 = por %p4047_p2, %p4046_p12 }
  0x7f   : > { %p4049_p4 = pnand %p4048_p8, %p4042_p3 }
  0x81   : > { %4052 = shalt.err (!%p4049_p4)
}
  0x82   : > { %p5676_p6 = scmp.ne.s32.totalorder %s5667_s26, 0  ;;  %s4845_s2 = sshll.u32 %s4748_s3, 7 }
  0x83   : > { %s4848_s25 = sshll.u32 %s4547_s24, 11  ;;  %s5677_s6 = sld [smem:[#allocation45_spill]] }
  0x84   : > { %3688 = dma.hbm_to_vmem [thread:$0]  (!%p5676_p6), %s662_s28, 96, %s665_s1, %s4795_s14  }
  0x85   : > { %s675_s4 = scalar_lea.vmem [#allocation13], %s4845_s2  ;;  %s4860_s1 = sshll.u32 %s4547_s24, 4 }
  0x86   : > { %s682_s16 = sshll.u32 %s675_s4, 4  ;;  %s4857_s16 = int_to_ptr.vmem [resolvable:$true] %s682_s16 }
  0x89   : > { %s4854_s17 = scalar_lea.hbm %s5677_s6, %s4848_s25  ;;  %s4058_s15 = scalar_lea.hbm %s5677_s6, 4096 }
  0x8a   : > { %s4053_s30 = scalar_lea.hbm %s4854_s17, 2048  ;;  %p4059_p11 = scmp.lt.u32.totalorder %s4854_s17, %s5677_s6 }
  0x8b   : > { %p4054_p8 = scmp.ne.s32.totalorder %s4854_s17, %s4053_s30  ;;  %p4060_p13 = scmp.lt.u32.totalorder %s4058_s15, %s4053_s30 }
  0x8c   : > { %p4062_p10 = scmp.lt.u32.totalorder %s4053_s30, %s4854_s17 }
  0x8d   : > { %p4056_p0 = pnand %p4054_p8, %p4801_p9  ;;  %p4061_p5 = por %p4060_p13, %p4059_p11 }
  0x8f   : > { %p4057_p7 = pneg %p4056_p0  ;;  %p4063_p1 = por %p4062_p10, %p4061_p5 }
  0x91   : > { %p4064_p3 = pnand %p4063_p1, %p4057_p7 }
  0x93   : > { %4067 = shalt.err (!%p4064_p3)
}
  0x94   : > { %s4068_s24 = scalar_lea.vmem %s4857_s16, 2048  ;;  %s4556_s0 = smov [#allocation13]  }
  0x95   : > { %p4069_p12 = scmp.ne.s32.totalorder %s4857_s16, %s4068_s24  ;;  %s4073_s18 = sshll.u32 %s4556_s0, 4  ;;  %s4074_s18 = int_to_ptr.vmem [resolvable:$false] %s4073_s18 }
  0x96   : > { %s4075_s19 = scalar_lea.vmem %s4074_s18, 4096  ;;  %p4076_p8 = scmp.lt.s32.totalorder %s4857_s16, %s4074_s18 }
  0x97   : > { %p4071_p2 = pnand %p4069_p12, %p4801_p9  ;;  %p4077_p0 = scmp.lt.s32.totalorder %s4075_s19, %s4068_s24 }
  0x99   : > { %p4072_p4 = pneg %p4071_p2  ;;  %p4078_p11 = por %p4077_p0, %p4076_p8 }
  0x9b   : > { %p4079_p13 = pnand %p4078_p11, %p4072_p4 }
  0x9d   : > { %4082 = shalt.err (!%p4079_p13)
}
  0x9e   : > { %s5630_s23 = smov 64   ;;  %s5631_s4 = smov 4  }
  0x9f   : > { %3691 = dma.hbm_to_vmem [thread:$0]  (!%p5676_p6), %s4854_s17, 2048, %s4857_s16, %s4795_s14, %s5630_s23, %s5630_s23, %s5631_s4  }
  0xa0   : > { %s5678_s7 = sld [smem:[#allocation46_spill]]  ;;  %s695_s15 = scalar_lea.vmem [#allocation14], %s4748_s3 }
  0xa1   : > { %s702_s29 = sshll.u32 %s695_s15, 4  ;;  %s703_s29 = int_to_ptr.vmem [resolvable:$true] %s702_s29 }
  0xa6   : > { %s4891_s22 = scalar_lea.hbm %s5678_s7, %s4860_s1  ;;  %s4088_s17 = scalar_lea.hbm %s5678_s7, 32 }
  0xa7   : > { %s4083_s27 = scalar_lea.hbm %s4891_s22, 16  ;;  %p4089_p1 = scmp.lt.u32.totalorder %s4891_s22, %s5678_s7 }
  0xa8   : > { %p4084_p7 = scmp.ne.s32.totalorder %s4891_s22, %s4083_s27  ;;  %p4090_p3 = scmp.lt.u32.totalorder %s4088_s17, %s4083_s27 }
  0xa9   : > { %p4092_p2 = scmp.lt.u32.totalorder %s4083_s27, %s4891_s22 }
  0xaa   : > { %p4086_p5 = pnand %p4084_p7, %p4801_p9  ;;  %p4091_p12 = por %p4090_p3, %p4089_p1 }
  0xac   : > { %p4087_p10 = pneg %p4086_p5  ;;  %p4093_p4 = por %p4092_p2, %p4091_p12 }
  0xae   : > { %p4094_p8 = pnand %p4093_p4, %p4087_p10 }
  0xb0   : > { %4097 = shalt.err (!%p4094_p8)
}
  0xb1   : > { %s4098_s19 = scalar_lea.vmem %s703_s29, 16  ;;  %s4559_s30 = smov [#allocation14]  }
  0xb2   : > { %p4099_p0 = scmp.ne.s32.totalorder %s703_s29, %s4098_s19  ;;  %s4103_s28 = sshll.u32 %s4559_s30, 4  ;;  %s4104_s28 = int_to_ptr.vmem [resolvable:$false] %s4103_s28 }
  0xb3   : > { %s4105_s15 = scalar_lea.vmem %s4104_s28, 32  ;;  %p4106_p7 = scmp.lt.s32.totalorder %s703_s29, %s4104_s28 }
  0xb4   : > { %p4101_p11 = pnand %p4099_p0, %p4801_p9  ;;  %p4107_p5 = scmp.lt.s32.totalorder %s4105_s15, %s4098_s19 }
  0xb6   : > { %p4102_p13 = pneg %p4101_p11  ;;  %p4108_p6 = por %p4107_p5, %p4106_p7 }
  0xb8   : > { %p4109_p1 = pnand %p4108_p6, %p4102_p13 }
  0xba   : > { %4112 = shalt.err (!%p4109_p1)
}
  0xbb   : > { %p5679_p3 = scmp.ne.s32.totalorder %s5667_s26, 0  ;;  %s5680_s8 = sld [smem:[#allocation47_spill]] }
  0xbc   : > { %s712_s17 = scalar_lea.vmem [#allocation15], %s4748_s3 }
  0xbd   : > { %3694 = dma.hbm_to_vmem [thread:$0]  (!%p5679_p3), %s4891_s22, 16, %s703_s29, %s4795_s14  }
  0xbe   : > { %s719_s16 = sshll.u32 %s712_s17, 4  ;;  %s720_s16 = int_to_ptr.vmem [resolvable:$true] %s719_s16 }
  0xc1   : > { %s4916_s0 = scalar_lea.hbm %s5680_s8, %s4860_s1  ;;  %s4118_s22 = scalar_lea.hbm %s5680_s8, 32 }
  0xc2   : > { %s4113_s18 = scalar_lea.hbm %s4916_s0, 16  ;;  %p4119_p2 = scmp.lt.u32.totalorder %s4916_s0, %s5680_s8 }
  0xc3   : > { %p4114_p6 = scmp.ne.s32.totalorder %s4916_s0, %s4113_s18  ;;  %p4120_p4 = scmp.lt.u32.totalorder %s4118_s22, %s4113_s18 }
  0xc4   : > { %p4122_p0 = scmp.lt.u32.totalorder %s4113_s18, %s4916_s0 }
  0xc5   : > { %p4116_p10 = pnand %p4114_p6, %p4801_p9  ;;  %p4121_p8 = por %p4120_p4, %p4119_p2 }
  0xc7   : > { %p4117_p12 = pneg %p4116_p10  ;;  %p4123_p11 = por %p4122_p0, %p4121_p8 }
  0xc9   : > { %p4124_p13 = pnand %p4123_p11, %p4117_p12 }
  0xcb   : > { %4127 = shalt.err (!%p4124_p13)
}
  0xcc   : > { %s4128_s15 = scalar_lea.vmem %s720_s16, 16  ;;  %s4560_s27 = smov [#allocation15]  }
  0xcd   : > { %p4129_p7 = scmp.ne.s32.totalorder %s720_s16, %s4128_s15  ;;  %s4133_s24 = sshll.u32 %s4560_s27, 4  ;;  %s4134_s24 = int_to_ptr.vmem [resolvable:$false] %s4133_s24 }
  0xce   : > { %s4135_s17 = scalar_lea.vmem %s4134_s24, 32  ;;  %p4136_p6 = scmp.lt.s32.totalorder %s720_s16, %s4134_s24 }
  0xcf   : > { %p4131_p5 = pnand %p4129_p7, %p4801_p9  ;;  %p4137_p10 = scmp.lt.s32.totalorder %s4135_s17, %s4128_s15 }
  0xd1   : > { %p4132_p1 = pneg %p4131_p5  ;;  %p4138_p3 = por %p4137_p10, %p4136_p6 }
  0xd3   : > { %p4139_p2 = pnand %p4138_p3, %p4132_p1 }
  0xd5   : > { %4142 = shalt.err (!%p4139_p2)
}
  0xd6   : > { %p5681_p4 = scmp.ne.s32.totalorder %s5667_s26, 0  ;;  %s5682_s9 = sld [smem:[#allocation48_spill]] }
  0xd7   : > { %s729_s22 = scalar_lea.vmem [#allocation16], %s4748_s3 }
  0xd8   : > { %3697 = dma.hbm_to_vmem [thread:$0]  (!%p5681_p4), %s4916_s0, 16, %s720_s16, %s4795_s14  }
  0xd9   : > { %s736_s29 = sshll.u32 %s729_s22, 4  ;;  %s737_s29 = int_to_ptr.vmem [resolvable:$true] %s736_s29 }
  0xdc   : > { %s4941_s30 = scalar_lea.hbm %s5682_s9, %s4860_s1  ;;  %s4148_s0 = scalar_lea.hbm %s5682_s9, 32 }
  0xdd   : > { %s4143_s28 = scalar_lea.hbm %s4941_s30, 16  ;;  %p4149_p0 = scmp.lt.u32.totalorder %s4941_s30, %s5682_s9 }
  0xde   : > { %p4144_p3 = scmp.ne.s32.totalorder %s4941_s30, %s4143_s28  ;;  %p4150_p11 = scmp.lt.u32.totalorder %s4148_s0, %s4143_s28 }
  0xdf   : > { %p4152_p7 = scmp.lt.u32.totalorder %s4143_s28, %s4941_s30 }
  0xe0   : > { %p4146_p12 = pnand %p4144_p3, %p4801_p9  ;;  %p4151_p13 = por %p4150_p11, %p4149_p0 }
  0xe2   : > { %p4147_p8 = pneg %p4146_p12  ;;  %p4153_p5 = por %p4152_p7, %p4151_p13 }
  0xe4   : > { %p4154_p1 = pnand %p4153_p5, %p4147_p8 }
  0xe6   : > { %4157 = shalt.err (!%p4154_p1)
}
  0xe7   : > { %s4158_s17 = scalar_lea.vmem %s737_s29, 16  ;;  %s4561_s18 = smov [#allocation16]  }
  0xe8   : > { %p4159_p6 = scmp.ne.s32.totalorder %s737_s29, %s4158_s17  ;;  %s4163_s19 = sshll.u32 %s4561_s18, 4  ;;  %s4164_s19 = int_to_ptr.vmem [resolvable:$false] %s4163_s19 }
  0xe9   : > { %s4165_s22 = scalar_lea.vmem %s4164_s19, 32  ;;  %p4166_p3 = scmp.lt.s32.totalorder %s737_s29, %s4164_s19 }
  0xea   : > { %p4161_p10 = pnand %p4159_p6, %p4801_p9  ;;  %p4167_p12 = scmp.lt.s32.totalorder %s4165_s22, %s4158_s17 }
  0xec   : > { %p4162_p2 = pneg %p4161_p10  ;;  %p4168_p4 = por %p4167_p12, %p4166_p3 }
  0xee   : > { %p4169_p0 = pnand %p4168_p4, %p4162_p2 }
  0xf0   : > { %4172 = shalt.err (!%p4169_p0)
}
  0xf1   : > { %p5683_p11 = scmp.ne.s32.totalorder %s5667_s26, 0  ;;  %s5684_s10 = sld [smem:[#allocation49_spill]] }
  0xf2   : > { %s747_s0 = scalar_lea.vmem [#allocation17], %s4845_s2 }
  0xf3   : > { %3700 = dma.hbm_to_vmem [thread:$0]  (!%p5683_p11), %s4941_s30, 16, %s737_s29, %s4795_s14  }
  0xf4   : > { %s754_s16 = sshll.u32 %s747_s0, 4  ;;  %s4969_s16 = int_to_ptr.vmem [resolvable:$true] %s754_s16 }
  0xf7   : > { %s4966_s27 = scalar_lea.hbm %s5684_s10, %s4848_s25  ;;  %s4178_s29 = scalar_lea.hbm %s5684_s10, 4096 }
  0xf8   : > { %s4173_s24 = scalar_lea.hbm %s4966_s27, 2048  ;;  %p4179_p7 = scmp.lt.u32.totalorder %s4966_s27, %s5684_s10 }
  0xf9   : > { %p4174_p4 = scmp.ne.s32.totalorder %s4966_s27, %s4173_s24  ;;  %p4180_p5 = scmp.lt.u32.totalorder %s4178_s29, %s4173_s24 }
  0xfa   : > { %p4182_p6 = scmp.lt.u32.totalorder %s4173_s24, %s4966_s27 }
  0xfb   : > { %p4176_p8 = pnand %p4174_p4, %p4801_p9  ;;  %p4181_p1 = por %p4180_p5, %p4179_p7 }
  0xfd   : > { %p4177_p13 = pneg %p4176_p8  ;;  %p4183_p10 = por %p4182_p6, %p4181_p1 }
  0xff   : > { %p4184_p2 = pnand %p4183_p10, %p4177_p13 }
 0x101   : > { %4187 = shalt.err (!%p4184_p2)
}
 0x102   : > { %s4188_s22 = scalar_lea.vmem %s4969_s16, 2048  ;;  %s4562_s28 = smov [#allocation17]  }
 0x103   : > { %p4189_p3 = scmp.ne.s32.totalorder %s4969_s16, %s4188_s22  ;;  %s4193_s15 = sshll.u32 %s4562_s28, 4  ;;  %s4194_s15 = int_to_ptr.vmem [resolvable:$false] %s4193_s15 }
 0x104   : > { %s4195_s0 = scalar_lea.vmem %s4194_s15, 4096  ;;  %p4196_p4 = scmp.lt.s32.totalorder %s4969_s16, %s4194_s15 }
 0x105   : > { %p4191_p12 = pnand %p4189_p3, %p4801_p9  ;;  %p4197_p8 = scmp.lt.s32.totalorder %s4195_s0, %s4188_s22 }
 0x107   : > { %p4192_p0 = pneg %p4191_p12  ;;  %p4198_p7 = por %p4197_p8, %p4196_p4 }
 0x109   : > { %p4199_p5 = pnand %p4198_p7, %p4192_p0 }
 0x10b   : > { %4202 = shalt.err (!%p4199_p5)
}
 0x10c   : > { %s5685_s24 = smov 8   ;;  %s5686_s17 = smov 128  }
 0x10d   : > { %3703 = dma.hbm_to_vmem [thread:$0]  (!%p5683_p11), %s4966_s27, 2048, %s4969_s16, %s4795_s14, %s5686_s17, %s5686_s17, %s5685_s24  }
 0x10e   : > { %s5687_s12 = sld [smem:[#allocation51_spill]]  ;;  %s775_s19 = scalar_lea.vmem [#allocation18], %s4845_s2 }
 0x10f   : > { %s782_s22 = sshll.u32 %s775_s19, 4  ;;  %s5003_s22 = int_to_ptr.vmem [resolvable:$true] %s782_s22 }
 0x114   : > { %s5000_s18 = scalar_lea.hbm %s5687_s12, %s4848_s25  ;;  %s4208_s16 = scalar_lea.hbm %s5687_s12, 4096 }
 0x115   : > { %s4203_s28 = scalar_lea.hbm %s5000_s18, 2048  ;;  %p4209_p10 = scmp.lt.u32.totalorder %s5000_s18, %s5687_s12 }
 0x116   : > { %p4204_p13 = scmp.ne.s32.totalorder %s5000_s18, %s4203_s28  ;;  %p4210_p2 = scmp.lt.u32.totalorder %s4208_s16, %s4203_s28 }
 0x117   : > { %p4212_p12 = scmp.lt.u32.totalorder %s4203_s28, %s5000_s18 }
 0x118   : > { %p4206_p1 = pnand %p4204_p13, %p4801_p9  ;;  %p4211_p3 = por %p4210_p2, %p4209_p10 }
 0x11a   : > { %p4207_p6 = pneg %p4206_p1  ;;  %p4213_p0 = por %p4212_p12, %p4211_p3 }
 0x11c   : > { %p4214_p4 = pnand %p4213_p0, %p4207_p6 }
 0x11e   : > { %4217 = shalt.err (!%p4214_p4)
}
 0x11f   : > { %s4218_s2 = scalar_lea.vmem %s5003_s22, 2048  ;;  %s4563_s24 = smov [#allocation18]  }
 0x120   : > { %p4219_p8 = scmp.ne.s32.totalorder %s5003_s22, %s4218_s2  ;;  %s4223_s17 = sshll.u32 %s4563_s24, 4  ;;  %s4224_s17 = int_to_ptr.vmem [resolvable:$false] %s4223_s17 }
 0x121   : > { %s4225_s30 = scalar_lea.vmem %s4224_s17, 4096  ;;  %p4226_p13 = scmp.lt.s32.totalorder %s5003_s22, %s4224_s17 }
 0x122   : > { %p4221_p7 = pnand %p4219_p8, %p4801_p9  ;;  %p4227_p1 = scmp.lt.s32.totalorder %s4225_s30, %s4218_s2 }
 0x124   : > { %p4222_p5 = pneg %p4221_p7  ;;  %p4228_p10 = por %p4227_p1, %p4226_p13 }
 0x126   : > { %p4229_p2 = pnand %p4228_p10, %p4222_p5 }
 0x128   : > { %4232 = shalt.err (!%p4229_p2)
}
 0x129   : > { %3706 = dma.hbm_to_vmem [thread:$0]  (!%p5683_p11), %s5000_s18, 2048, %s5003_s22, %s4795_s14, %s5630_s23, %s5630_s23, %s5631_s4  }
 0x12a   : > { %s4564_s29 = smov [#allocation6]   ;;  %s5688_s27 = sld [smem:[#allocation40_spill]] }
 0x12b   : > { %s565_s19 = sshll.u32 %s4564_s29, 4  ;;  %p5689_p3 = scmp.ne.s32.totalorder %s5669_s11, 0  ;;  %s566_s19 = int_to_ptr.vmem [resolvable:$true] %s565_s19 }
 0x130   : > { %s4233_s16 = scalar_lea.hbm %s5688_s27, 32 }
 0x131   : > { %p4234_p6 = scmp.ne.s32.totalorder %s5688_s27, %s4233_s16  ;;  %p4240_p4 = scmp.lt.u32.totalorder %s4233_s16, %s5688_s27 }
 0x133   : > { %p4236_p12 = pnand %p4234_p6, %p5689_p3 }
 0x135   : > { %p4237_p0 = pneg %p4236_p12 }
 0x137   : > { %p4242_p8 = pnand %p4240_p4, %p4237_p0 }
 0x139   : > { %4245 = shalt.err (!%p4242_p8)
}
 0x13a   : > { %s4246_s18 = scalar_lea.vmem %s566_s19, 32  ;;  %p4254_p1 = scmp.lt.s32.totalorder %s566_s19, %s566_s19 }
 0x13b   : > { %p4247_p7 = scmp.ne.s32.totalorder %s566_s19, %s4246_s18  ;;  %p4255_p10 = scmp.lt.s32.totalorder %s4246_s18, %s4246_s18 }
 0x13d   : > { %p4249_p5 = pnand %p4247_p7, %p5689_p3  ;;  %p4256_p2 = por %p4255_p10, %p4254_p1 }
 0x13f   : > { %p4250_p13 = pneg %p4249_p5 }
 0x141   : > { %p4257_p11 = pnand %p4256_p2, %p4250_p13 }
 0x143   : > { %4260 = shalt.err (!%p4257_p11)
}
 0x144   : > { %s4565_s22 = smov 16   ;;  %s4566_s17 = smov 1  }
 0x145   : > { %p5690_p6 = scmp.ne.s32.totalorder %s5666_s21, 0  ;;  %s5052_s16 = scalar_lea.hbm %s5586_s13, %s4860_s1 }
 0x146   : > { %s795_s0 = scalar_lea.vmem [#allocation19], %s4748_s3  ;;  %s4567_s2 = smov [#allocation8]  }
 0x147   : > { %3669 = dma.hbm_to_vmem [thread:$0]  (!%p5690_p6), %s5688_s27, 32, %s566_s19, [#allocation7], %s4565_s22, %s4565_s22, %s4566_s17  }
 0x148   : > { %s802_s25 = sshll.u32 %s795_s0, 4  ;;  %s579_s24 = sshll.u32 %s4567_s2, 4  ;;  %s5055_s25 = int_to_ptr.vmem [resolvable:$true] %s802_s25  ;;  %s580_s24 = int_to_ptr.vmem [resolvable:$true] %s579_s24 }
 0x149   : > { %s4261_s18 = scalar_lea.hbm %s5052_s16, 16  ;;  %s4266_s17 = scalar_lea.hbm %s5586_s13, 32 }
 0x14a   : > { %p4262_p11 = scmp.ne.s32.totalorder %s5052_s16, %s4261_s18  ;;  %p4267_p4 = scmp.lt.u32.totalorder %s5052_s16, %s5586_s13 }
 0x14b   : > { %p4268_p8 = scmp.lt.u32.totalorder %s4266_s17, %s4261_s18  ;;  %p4270_p5 = scmp.lt.u32.totalorder %s4261_s18, %s5052_s16 }
 0x14c   : > { %p4264_p12 = pnand %p4262_p11, %p4801_p9 }
 0x14d   : > { %p4269_p7 = por %p4268_p8, %p4267_p4 }
 0x14e   : > { %p4265_p0 = pneg %p4264_p12 }
 0x14f   : > { %p4271_p13 = por %p4270_p5, %p4269_p7 }
 0x151   : > { %p4272_p1 = pnand %p4271_p13, %p4265_p0 }
 0x153   : > { %4275 = shalt.err (!%p4272_p1)
}
 0x154   : > { %s4276_s28 = scalar_lea.vmem %s5055_s25, 16  ;;  %s4568_s15 = smov [#allocation19]  }
 0x155   : > { %p4277_p10 = scmp.ne.s32.totalorder %s5055_s25, %s4276_s28  ;;  %s4281_s0 = sshll.u32 %s4568_s15, 4  ;;  %s4282_s0 = int_to_ptr.vmem [resolvable:$false] %s4281_s0 }
 0x156   : > { %s4283_s2 = scalar_lea.vmem %s4282_s0, 32  ;;  %p4284_p12 = scmp.lt.s32.totalorder %s5055_s25, %s4282_s0 }
 0x157   : > { %p4279_p2 = pnand %p4277_p10, %p4801_p9  ;;  %p4285_p6 = scmp.lt.s32.totalorder %s4283_s2, %s4276_s28 }
 0x159   : > { %p4280_p11 = pneg %p4279_p2  ;;  %p4286_p4 = por %p4285_p6, %p4284_p12 }
 0x15b   : > { %p4287_p8 = pnand %p4286_p4, %p4280_p11 }
 0x15d   : > { %4290 = shalt.err (!%p4287_p8)
}
 0x15e   : > { %p5691_p0 = scmp.ne.s32.totalorder %s5667_s26, 0  ;;  %s5692_s22 = sld [smem:[#allocation41_spill]] }
 0x160   : > { %3709 = dma.hbm_to_vmem [thread:$0]  (!%p5691_p0), %s5052_s16, 16, %s5055_s25, %s4795_s14  }
 0x164   : > { %s5693_s17 = smov %s5692_s22  ;;  %s4291_s30 = scalar_lea.hbm %s5692_s22, 16 }
 0x165   : > { %p4292_p7 = scmp.ne.s32.totalorder %s5693_s17, %s4291_s30  ;;  %p4298_p13 = scmp.lt.u32.totalorder %s4291_s30, %s5693_s17 }
 0x167   : > { %p4294_p6 = pnand %p4292_p7, %p5689_p3 }
 0x169   : > { %p4295_p5 = pneg %p4294_p6 }
 0x16b   : > { %p4300_p1 = pnand %p4298_p13, %p4295_p5 }
 0x16d   : > { %4303 = shalt.err (!%p4300_p1)
}
 0x16e   : > { %s4304_s2 = scalar_lea.vmem %s580_s24, 16  ;;  %s4311_s16 = scalar_lea.vmem %s580_s24, 32 }
 0x16f   : > { %p4305_p10 = scmp.ne.s32.totalorder %s580_s24, %s4304_s2  ;;  %p4312_p12 = scmp.lt.s32.totalorder %s580_s24, %s580_s24 }
 0x170   : > { %p4313_p4 = scmp.lt.s32.totalorder %s4311_s16, %s4304_s2 }
 0x171   : > { %p4307_p2 = pnand %p4305_p10, %p5689_p3 }
 0x172   : > { %p4314_p8 = por %p4313_p4, %p4312_p12 }
 0x173   : > { %p4308_p11 = pneg %p4307_p2 }
 0x175   : > { %p4315_p0 = pnand %p4314_p8, %p4308_p11 }
 0x177   : > { %4318 = shalt.err (!%p4315_p0)
}
 0x178   : > { %p5694_p7 = scmp.ne.s32.totalorder %s5666_s21, 0  ;;  %s4569_s19 = smov [#allocation9]  }
 0x179   : > { %s590_s22 = sshll.u32 %s4569_s19, 4  ;;  %s5695_s15 = sld [smem:[#allocation52_spill]]  ;;  %s591_s22 = int_to_ptr.vmem [resolvable:$true] %s590_s22 }
 0x17a   : > { %3672 = dma.hbm_to_vmem [thread:$0]  (!%p5694_p7), %s5693_s17, 16, %s580_s24, [#allocation7]  }
 0x17b   : > { %s5696_s16 = sld [smem:[#allocation42_spill]] }
 0x17f   : > { %s5101_s28 = scalar_lea.hbm %s5695_s15, %s4860_s1 }
 0x181   : > { %s4319_s23 = scalar_lea.hbm %s5696_s16, 16 }
 0x182   : > { %p4320_p0 = scmp.ne.s32.totalorder %s5696_s16, %s4319_s23  ;;  %p4326_p13 = scmp.lt.u32.totalorder %s4319_s23, %s5696_s16 }
 0x184   : > { %p4322_p6 = pnand %p4320_p0, %p5689_p3 }
 0x186   : > { %p4323_p5 = pneg %p4322_p6 }
 0x188   : > { %p4328_p1 = pnand %p4326_p13, %p4323_p5 }
 0x18a   : > { %4331 = shalt.err (!%p4328_p1)
}
 0x18b   : > { %s4332_s18 = scalar_lea.vmem %s591_s22, 16  ;;  %s4339_s19 = scalar_lea.vmem %s591_s22, 32 }
 0x18c   : > { %p4333_p10 = scmp.ne.s32.totalorder %s591_s22, %s4332_s18  ;;  %p4340_p12 = scmp.lt.s32.totalorder %s591_s22, %s591_s22 }
 0x18d   : > { %p4341_p4 = scmp.lt.s32.totalorder %s4339_s19, %s4332_s18 }
 0x18e   : > { %p4335_p2 = pnand %p4333_p10, %p5689_p3 }
 0x18f   : > { %p4342_p8 = por %p4341_p4, %p4340_p12 }
 0x190   : > { %p4336_p11 = pneg %p4335_p2 }
 0x192   : > { %p4343_p9 = pnand %p4342_p8, %p4336_p11 }
 0x194   : > { %4346 = shalt.err (!%p4343_p9)
}
 0x195   : > { %3675 = dma.hbm_to_vmem [thread:$0]  (!%p5694_p7), %s5696_s16, 16, %s591_s22, [#allocation10]  }
 0x196   : > { %s812_s23 = scalar_lea.vmem [#allocation20], %s4748_s3  ;;  %s4570_s29 = smov [#allocation22]  }
 0x197   : > { %s819_s30 = sshll.u32 %s812_s23, 4  ;;  %s600_s0 = sshll.u32 %s4570_s29, 4  ;;  %s5122_s30 = int_to_ptr.vmem [resolvable:$true] %s819_s30  ;;  %s601_s0 = int_to_ptr.vmem [resolvable:$true] %s600_s0 }
 0x198   : > { %s4347_s2 = scalar_lea.hbm %s5101_s28, 16  ;;  %p5697_p0 = scmp.ne.s32.totalorder %s5674_s20, 0 }
 0x199   : > { %p4348_p9 = scmp.ne.s32.totalorder %s5101_s28, %s4347_s2  ;;  %s4352_s18 = scalar_lea.hbm %s5695_s15, 32 }
 0x19a   : > { %p4353_p13 = scmp.lt.u32.totalorder %s5101_s28, %s5695_s15  ;;  %p4354_p1 = scmp.lt.u32.totalorder %s4352_s18, %s4347_s2 }
 0x19b   : > { %p4350_p6 = pnand %p4348_p9, %p5697_p0  ;;  %p4356_p2 = scmp.lt.u32.totalorder %s4347_s2, %s5101_s28 }
 0x19c   : > { %p4355_p10 = por %p4354_p1, %p4353_p13 }
 0x19d   : > { %p4351_p5 = pneg %p4350_p6 }
 0x19e   : > { %p4357_p11 = por %p4356_p2, %p4355_p10 }
 0x1a0   : > { %p4358_p12 = pnand %p4357_p11, %p4351_p5 }
 0x1a2   : > { %4361 = shalt.err (!%p4358_p12)
}
 0x1a3   : > { %s4362_s22 = scalar_lea.vmem %s5122_s30, 16  ;;  %s4571_s4 = smov [#allocation20]  }
 0x1a4   : > { %p4363_p4 = scmp.ne.s32.totalorder %s5122_s30, %s4362_s22  ;;  %s4367_s23 = sshll.u32 %s4571_s4, 4  ;;  %s4368_s23 = int_to_ptr.vmem [resolvable:$false] %s4367_s23 }
 0x1a5   : > { %s4369_s29 = scalar_lea.vmem %s4368_s23, 32  ;;  %p4370_p6 = scmp.lt.s32.totalorder %s5122_s30, %s4368_s23 }
 0x1a6   : > { %p4365_p8 = pnand %p4363_p4, %p5697_p0  ;;  %p4371_p7 = scmp.lt.s32.totalorder %s4369_s29, %s4362_s22 }
 0x1a8   : > { %p4366_p9 = pneg %p4365_p8  ;;  %p4372_p13 = por %p4371_p7, %p4370_p6 }
 0x1aa   : > { %p4373_p1 = pnand %p4372_p13, %p4366_p9 }
 0x1ac   : > { %4376 = shalt.err (!%p4373_p1)
}
 0x1ad   : > { %p5698_p5 = scmp.ne.s32.totalorder %s5667_s26, 0  ;;  %s5699_s25 = sld [smem:[#allocation54_spill]] }
 0x1af   : > { %3712 = dma.hbm_to_vmem [thread:$0]  (!%p5698_p5), %s5101_s28, 16, %s5122_s30, %s4795_s14  }
 0x1b3   : > { %s4377_s18 = scalar_lea.hbm %s5699_s25, 1024 }
 0x1b4   : > { %p4378_p10 = scmp.ne.s32.totalorder %s5699_s25, %s4377_s18  ;;  %p4384_p11 = scmp.lt.u32.totalorder %s4377_s18, %s5699_s25 }
 0x1b6   : > { %p4380_p7 = pnand %p4378_p10, %p5689_p3 }
 0x1b8   : > { %p4381_p2 = pneg %p4380_p7 }
 0x1ba   : > { %p4386_p12 = pnand %p4384_p11, %p4381_p2 }
 0x1bc   : > { %4389 = shalt.err (!%p4386_p12)
}
 0x1bd   : > { %s4390_s23 = scalar_lea.vmem %s601_s0, 1024  ;;  %p4398_p6 = scmp.lt.s32.totalorder %s601_s0, %s601_s0 }
 0x1be   : > { %p4391_p4 = scmp.ne.s32.totalorder %s601_s0, %s4390_s23  ;;  %p4399_p13 = scmp.lt.s32.totalorder %s4390_s23, %s4390_s23 }
 0x1c0   : > { %p4393_p8 = pnand %p4391_p4, %p5689_p3  ;;  %p4400_p1 = por %p4399_p13, %p4398_p6 }
 0x1c2   : > { %p4394_p9 = pneg %p4393_p8 }
 0x1c4   : > { %p4401_p5 = pnand %p4400_p1, %p4394_p9 }
 0x1c6   : > { %4404 = shalt.err (!%p4401_p5)
}
 0x1c7   : > { %p5700_p10 = scmp.ne.s32.totalorder %s5666_s21, 0  ;;  %s5701_s28 = smov 4  }
 0x1c8   : > { %s5702_s30 = smov 64   ;;  %s4572_s24 = smov [#allocation23]  }
 0x1c9   : > { %3678 = dma.hbm_to_vmem [thread:$0]  (!%p5700_p10), %s5699_s25, 1024, %s601_s0, [#allocation7], %s5702_s30, %s5702_s30, %s5701_s28  }
 0x1ca   : > { %s614_s18 = sshll.u32 %s4572_s24, 4  ;;  %s5703_s22 = sld [smem:[#allocation53_spill]]  ;;  %s615_s18 = int_to_ptr.vmem [resolvable:$true] %s614_s18 }
 0x1cb   : > { %s5705_s8 = sld [smem:[#allocation55_spill]] }
 0x1d0   : > { %s5704_s4 = smov %s5703_s22  ;;  %s5171_s23 = scalar_lea.hbm %s5703_s22, %s4860_s1 }
 0x1d1   : > { %s4405_s9 = scalar_lea.hbm %s5705_s8, 16 }
 0x1d2   : > { %p4406_p5 = scmp.ne.s32.totalorder %s5705_s8, %s4405_s9  ;;  %p4412_p11 = scmp.lt.u32.totalorder %s4405_s9, %s5705_s8 }
 0x1d4   : > { %p4408_p7 = pnand %p4406_p5, %p5689_p3 }
 0x1d6   : > { %p4409_p2 = pneg %p4408_p7 }
 0x1d8   : > { %p4414_p12 = pnand %p4412_p11, %p4409_p2 }
 0x1da   : > { %4417 = shalt.err (!%p4414_p12)
}
 0x1db   : > { %s4418_s30 = scalar_lea.vmem %s615_s18, 16  ;;  %s4425_s6 = scalar_lea.vmem %s615_s18, 32 }
 0x1dc   : > { %p4419_p4 = scmp.ne.s32.totalorder %s615_s18, %s4418_s30  ;;  %p4426_p6 = scmp.lt.s32.totalorder %s615_s18, %s615_s18 }
 0x1dd   : > { %p4427_p13 = scmp.lt.s32.totalorder %s4425_s6, %s4418_s30 }
 0x1de   : > { %p4421_p8 = pnand %p4419_p4, %p5689_p3 }
 0x1df   : > { %p4428_p1 = por %p4427_p13, %p4426_p6 }
 0x1e0   : > { %p4422_p9 = pneg %p4421_p8 }
 0x1e2   : > { %p4429_p0 = pnand %p4428_p1, %p4422_p9 }
 0x1e4   : > { %4432 = shalt.err (!%p4429_p0)
}
 0x1e5   : > { %3681 = dma.hbm_to_vmem [thread:$0]  (!%p5700_p10), %s5705_s8, 16, %s615_s18, [#allocation10]  }
 0x1e6   : > { %s829_s9 = scalar_lea.vmem [#allocation21], %s4748_s3  ;;  %s4433_s12 = scalar_lea.hbm %s5171_s23, 16 }
 0x1e7   : > { %s836_s11 = sshll.u32 %s829_s9, 4  ;;  %p4434_p3 = scmp.ne.s32.totalorder %s5171_s23, %s4433_s12  ;;  %s837_s11 = int_to_ptr.vmem [resolvable:$true] %s836_s11 }
 0x1e8   : > { %p5706_p5 = scmp.ne.s32.totalorder %s5674_s20, 0  ;;  %s4438_s29 = scalar_lea.hbm %s5704_s4, 32 }
 0x1e9   : > { %p4439_p2 = scmp.lt.u32.totalorder %s5171_s23, %s5704_s4  ;;  %p4440_p11 = scmp.lt.u32.totalorder %s4438_s29, %s4433_s12 }
 0x1ea   : > { %p4436_p7 = pnand %p4434_p3, %p5706_p5  ;;  %p4442_p4 = scmp.lt.u32.totalorder %s4433_s12, %s5171_s23 }
 0x1eb   : > { %p4441_p12 = por %p4440_p11, %p4439_p2 }
 0x1ec   : > { %p4437_p0 = pneg %p4436_p7 }
 0x1ed   : > { %p4443_p10 = por %p4442_p4, %p4441_p12 }
 0x1ef   : > { %p4444_p8 = pnand %p4443_p10, %p4437_p0 }
 0x1f1   : > { %4447 = shalt.err (!%p4444_p8)
}
 0x1f2   : > { %s4448_s3 = scalar_lea.vmem %s837_s11, 16  ;;  %s4573_s18 = smov [#allocation21]  }
 0x1f3   : > { %p4449_p9 = scmp.ne.s32.totalorder %s837_s11, %s4448_s3  ;;  %s4453_s19 = sshll.u32 %s4573_s18, 4  ;;  %s4454_s19 = int_to_ptr.vmem [resolvable:$false] %s4453_s19 }
 0x1f4   : > { %s4455_s5 = scalar_lea.vmem %s4454_s19, 32  ;;  %p4456_p1 = scmp.lt.s32.totalorder %s837_s11, %s4454_s19 }
 0x1f5   : > { %p4451_p6 = pnand %p4449_p9, %p5706_p5  ;;  %p4457_p3 = scmp.lt.s32.totalorder %s4455_s5, %s4448_s3 }
 0x1f7   : > { %p4452_p13 = pneg %p4451_p6  ;;  %p4458_p7 = por %p4457_p3, %p4456_p1 }
 0x1f9   : > { %p4459_p2 = pnand %p4458_p7, %p4452_p13 }
 0x1fb   : > { %4462 = shalt.err (!%p4459_p2)
}
 0x1fc   : > { %p5707_p11 = scmp.ne.s32.totalorder %s5667_s26, 0  ;;  %s5708_s22 = sld [smem:[#allocation38_spill]] }
 0x1fe   : > { %3715 = dma.hbm_to_vmem [thread:$0]  (!%p5707_p11), %s5171_s23, 16, %s837_s11, %s4795_s14  }
 0x202   : > { %p5709_p0 = scmp.ne.s32.totalorder %s5708_s22, 0 }
 0x203   : > { %s5710_s20 = sld [smem:[#allocation34_spill]] (!%p5709_p0) }
 0x204   : > { %845 = sbr.rel (%p5709_p0) target bundleno = 4221 (0x107d), region = 100 }
 0x209   : > { %p5711_p5 = scmp.eq.s32.totalorder (!%p5709_p0), %s5710_s20, 0 }
 0x20b   : > { %4506 = dma.done.wait (%p5711_p5), [#allocation4], 256   ;;  %p5712_p12 = pmov %p5711_p5 }
 0x20c   : > { %p5713_p4 = pmov %p5711_p5 }
 0x20d   : > { %4508 = vsyncadd (%p5712_p12), [#allocation4], 4294967040 }
 0x20e   : > { %4510 = dma.done.wait (%p5713_p4), [#allocation7], 48   ;;  %p5714_p10 = pmov %p5713_p4 }
 0x20f   : > { %p5715_p8 = pmov %p5713_p4 }
 0x210   : > { %4512 = vsyncadd (%p5714_p10), [#allocation7], 4294967248 }
 0x211   : > { %4514 = dma.done.wait (%p5715_p8), [#allocation10], 16   ;;  %p5716_p9 = pmov %p5713_p4 }
 0x212   : > { %s5717_s14 = sld [smem:[#allocation32_spill]]  ;;  %s5718_s26 = sld [smem:[#allocation37_spill]] }
 0x213   : > { %4516 = vsyncadd (%p5716_p9), [#allocation10], 4294967280  ;;  %s863_s23 = sand.u32 1, %s5710_s20  }
 0x214   : > { %s864_s30 = scalar_lea.sflag [#allocation4], %s863_s23 }
 0x218   : > { %s5226_s0 = sand.u32 1, %s5717_s14   ;;  %p5719_p6 = scmp.ne.s32.totalorder %s5718_s26, 0 }
 0x219   : > { %s3611_s28 = smul.u32 384, %s5226_s0 }
 0x21b   : > { %s5229_s6 = scalar_lea.vmem [#allocation11], %s3611_s28 }
 0x21c   : > { %4518 = dma.done.wait (%p5719_p6), %s864_s30, 12480  }
 0x21d   : > { %4520 = vsyncadd (%p5719_p6), %s864_s30, 4294954816  ;;  %s3612_s7 = smul.u32 6, %s5226_s0  ;;  %s3246_s10 = sshll.u32 %s5226_s0, 7 }
 0x21e   : > { %s5239_s11 = scalar_lea.vmem [#allocation13], %s3246_s10  ;;  %s893_s12 = scalar_lea.vmem [#allocation14], %s5226_s0 }
 0x21f   : > { %s5237_s9 = scalar_lea.vmem [#allocation12], %s3612_s7  ;;  %s901_s1 = scalar_lea.vmem [#allocation15], %s5226_s0 }
 0x220   : > { %s909_s21 = scalar_lea.vmem [#allocation16], %s5226_s0  ;;  %s5244_s29 = scalar_lea.vmem [#allocation17], %s3246_s10 }
 0x221   : > { %s5246_s2 = scalar_lea.vmem [#allocation18], %s3246_s10  ;;  %s935_s24 = scalar_lea.vmem [#allocation19], %s5226_s0 }
 0x222   : > { %s943_s3 = scalar_lea.vmem [#allocation20], %s5226_s0  ;;  %s951_s18 = scalar_lea.vmem [#allocation21], %s5226_s0 }
 0x223   : > { %p5720_p13 = pmov %p5713_p4 }
 0x224   : > { %p5721_p1 = pmov %p5713_p4 }
 0x225   : > { %4522 = dma.done.wait (%p5720_p13), [#allocation7], 1024  }
 0x226   : > { %4524 = vsyncadd (%p5721_p1), [#allocation7], 4294966272  ;;  %p5722_p3 = pmov %p5721_p1 }
 0x227   : > { %p5723_p7 = pmov %p5721_p1 }
 0x228   : > { %4526 = dma.done.wait (%p5722_p3), [#allocation10], 16  }
 0x229   : > { %4528 = vsyncadd (%p5723_p7), [#allocation10], 4294967280  ;;  %p1059_p2 = scmp.lt.s32.totalorder %s5710_s20, 1  ;;  %s5724_s26 = sld [smem:[#allocation50_spill]] }
 0x22a   : > { %p5725_p11 = scmp.ne.s32.totalorder %s5710_s20, 0 }
 0x22b   : > { %s1060_s19 = scalar_select %p1059_p2, %s5710_s20, 1 }
 0x22c   : > { %1067 = sbr.rel (%p5725_p11) target bundleno = 873 (0x369), region = 172  ;;  %v1068_v0 = vld [vmem:[#allocation3] sm:$0xff] (!%p5725_p11)  ;;  %v1069_v1 = vld [vmem:[#allocation3 + $0x8] sm:$0xff] (!%p5725_p11)  ;;  %v3253_v17 = vld [vmem:[#allocation8] ss:$0 sm:$0xff] (!%p5725_p11) }
 0x22d   : > { %s3251_s5 = sshll.u32 %s1060_s19, 1  ;;  %1072 = vadd.xlane.f32.xlu0 (!%p5725_p11), %v1068_v0  ;;  %v3254_v19 = vld [vmem:[#allocation9] ss:$0 sm:$0xff] (!%p5725_p11) }
 0x22f   : > { %s5264_s23 = scalar_lea.vmem %s5724_s26, %s3251_s5 }
 0x231   : > { %1074 = vadd.xlane.f32.xlu0 (!%p5725_p11), %v1069_v1 }
 0x2ba   : > { %v1073_v2 = vpop.xlane.xlu0 %1072 }
 0x2bb   : > { %v1077_v3 = vmul.f32 0.0078125, %v1073_v2 }
 0x2bd   : > { %v1079_v4 = vsub.f32 %v1068_v0, %v1077_v3 }
 0x2be   : > { %v1075_v5 = vpop.xlane.xlu0 %1074 }
 0x2bf   : > { %v1078_v6 = vmul.f32 0.0078125, %v1075_v5  ;;  %v1081_v7 = vmul.f32 %v1079_v4, %v1079_v4 }
 0x2c1   : > { %v1080_v8 = vsub.f32 %v1069_v1, %v1078_v6  ;;  %1083 = vadd.xlane.f32.xlu1 %v1081_v7 }
 0x2c3   : > { %v1082_v9 = vmul.f32 %v1080_v8, %v1080_v8 }
 0x2c5   : > { %1085 = vadd.xlane.f32.xlu1 %v1082_v9 }
 0x34e   : > { %v1084_v10 = vpop.xlane.xlu1 %1083 }
 0x34f   : > { %v1087_v11 = vmul.f32 0.0078125, %v1084_v10 }
 0x351   : > { %v1089_v12 = vadd.f32 1e-12, %v1087_v11 }
 0x352   : > { %v1086_v13 = vpop.xlane.xlu1 %1085 }
 0x353   : > { %3783 = vrsqrt.f32 %v1089_v12  ;;  %v1088_v14 = vmul.f32 0.0078125, %v1086_v13 }
 0x355   : > { %v1090_v15 = vadd.f32 1e-12, %v1088_v14 }
 0x357   : > { %3785 = vrsqrt.f32 %v1090_v15 }
 0x35d   : > { %v3784_v16 = vpop.eup %3783 }
 0x35e   : > { %v1093_v18 = vmul.f32 %v3784_v16, %v1079_v4 }
 0x360   : > { %v1101_v20 = vmul.f32 %v3253_v17, %v1093_v18 }
 0x361   : > { %v3786_v21 = vpop.eup %3785 }
 0x362   : > { %v1109_v22 = vadd.f32 %v3254_v19, %v1101_v20  ;;  %v1094_v23 = vmul.f32 %v3786_v21, %v1080_v8 }
 0x364   : > { %1111 = vst [vmem:[#allocation2] sm:$0xff] %v1109_v22  ;;  %v1102_v24 = vmul.f32 %v3253_v17, %v1094_v23 }
 0x366   : > { %v1110_v25 = vadd.f32 %v3254_v19, %v1102_v24 }
 0x368   : > { %1112 = vst [vmem:[#allocation2 + $0x8] sm:$0xff] %v1110_v25 }
 0x369 PF: > { %v3787_v26 = vld [vmem:[%s5229_s6 + $0x4] ss:$24 sps:$4 sm:$0xff]   ;;  %v3789_v27 = vld [vmem:[%s5229_s6] ss:$24 sps:$4 sm:$0xff]   ;;  %v4574_v28 = vmov 0   ;;  %v4575_v14 = vmov 0.0   ;;  %v1168_v15 = vlaneseq }
 0x36a   : > { %1470 = vmatprep.mubr.bf16.mxu0 %v4574_v28  ;;  %1513 = vmatprep.mubr.bf16.mxu1 %v4574_v28  ;;  %v3790_v29 = vld [vmem:[%s5229_s6 + $0x34] ss:$24 sps:$4 sm:$0xff]   ;;  %v3792_v30 = vld [vmem:[%s5229_s6 + $0x30] ss:$24 sps:$4 sm:$0xff]   ;;  %v3793_v31 = vld [vmem:[%s5229_s6 + $0x64] ss:$24 sps:$4 sm:$0xff]  }
 0x36b   : > { %1438 = vmatprep.subr.bf16.mxu0 %v3787_v26  ;;  %v3795_v32 = vld [vmem:[%s5229_s6 + $0x60] ss:$24 sps:$4 sm:$0xff]   ;;  %v3796_v33 = vld [vmem:[%s5229_s6 + $0x94] ss:$24 sps:$4 sm:$0xff]   ;;  %v3798_v34 = vld [vmem:[%s5229_s6 + $0x90] ss:$24 sps:$4 sm:$0xff]  }
 0x36c   : > { %1439 = vmatpush1.bf16.msra.mxu0 %v3789_v27  ;;  %v3799_v35 = vld [vmem:[%s5229_s6 + $0xc4] ss:$24 sps:$4 sm:$0xff]   ;;  %v3801_v36 = vld [vmem:[%s5229_s6 + $0xc0] ss:$24 sps:$4 sm:$0xff]   ;;  %v3802_v39 = vld [vmem:[%s5229_s6 + $0xf4] ss:$24 sps:$4 sm:$0xff]  }
 0x36d   : > { %1440 = vmatprep.subr.bf16.mxu0 %v3790_v29  ;;  %v3817_v37 = vld [vmem:[%s5229_s6 + $0xc] ss:$24 sps:$4 sm:$0xff]   ;;  %v3819_v38 = vld [vmem:[%s5229_s6 + $0x8] ss:$24 sps:$4 sm:$0xff]   ;;  %v3823_v40 = vld [vmem:[%s5229_s6 + $0x3c] ss:$24 sps:$4 sm:$0xff]  }
 0x36e   : > { %1481 = vmatprep.subr.bf16.mxu1 %v3817_v37  ;;  %v3825_v41 = vld [vmem:[%s5229_s6 + $0x38] ss:$24 sps:$4 sm:$0xff]   ;;  %v3805_v43 = vld [vmem:[%s5229_s6 + $0x124] ss:$24 sps:$4 sm:$0xff]   ;;  %v3831_v45 = vld [vmem:[%s5229_s6 + $0x68] ss:$24 sps:$4 sm:$0xff]  }
 0x36f   : > { %1482 = vmatpush1.bf16.msra.mxu1 %v3819_v38  ;;  %v3804_v42 = vld [vmem:[%s5229_s6 + $0xf0] ss:$24 sps:$4 sm:$0xff]   ;;  %v3829_v44 = vld [vmem:[%s5229_s6 + $0x6c] ss:$24 sps:$4 sm:$0xff]   ;;  %v3835_v46 = vld [vmem:[%s5229_s6 + $0x9c] ss:$24 sps:$4 sm:$0xff]  }
 0x370   : > { %1441 = vmatpush1.bf16.msra.mxu0 %v3792_v30  ;;  %1483 = vmatprep.subr.bf16.mxu1 %v3823_v40  ;;  %v3807_v47 = vld [vmem:[%s5229_s6 + $0x120] ss:$24 sps:$4 sm:$0xff]   ;;  %v3808_v48 = vld [vmem:[%s5229_s6 + $0x154] ss:$24 sps:$4 sm:$0xff]   ;;  %v3810_v49 = vld [vmem:[%s5229_s6 + $0x150] ss:$24 sps:$4 sm:$0xff]  }
 0x371   : > { %1442 = vmatprep.subr.bf16.mxu0 %v3793_v31  ;;  %v5293_v50 = vld [vmem:[#allocation2] sm:$0xff]  ;;  %v3841_v52 = vld [vmem:[%s5229_s6 + $0xcc] ss:$24 sps:$4 sm:$0xff]   ;;  %v3811_v58 = vld [vmem:[%s5229_s6 + $0x10] ss:$24 sps:$4 sm:$0xff]   ;;  %vm4576_vm0 = vmmov 0  }
 0x372   : > { %v3837_v51 = vld [vmem:[%s5229_s6 + $0x98] ss:$24 sps:$4 sm:$0xff]   ;;  %v5297_v53 = vld [vmem:[#allocation2 + $0x8] sm:$0xff]  ;;  %v3813_v54 = vld [vmem:[%s5229_s6 + $0x14] ss:$24 sps:$4 sm:$0xff]   ;;  %v5331_v16 = vshrl.u32 %v1168_v15, 7 }
 0x373   : > { %1484 = vmatpush1.bf16.msra.mxu1 %v3825_v41  ;;  %v3843_v55 = vld [vmem:[%s5229_s6 + $0xc8] ss:$24 sps:$4 sm:$0xff]   ;;  %v1117_v56 = vpack.c.bf16 %v5297_v53, %v5293_v50  ;;  %v3847_v57 = vld [vmem:[%s5229_s6 + $0xfc] ss:$24 sps:$4 sm:$0xff]   ;;  %v3849_v60 = vld [vmem:[%s5229_s6 + $0xf8] ss:$24 sps:$4 sm:$0xff]  }
 0x374   : > { %1443 = vmatpush1.bf16.msra.mxu0 %v3795_v32  ;;  %1485 = vmatprep.subr.bf16.mxu1 %v3829_v44  ;;  %v3816_v59 = vld [vmem:[%s5229_s6 + $0x44] ss:$24 sps:$4 sm:$0xff]   ;;  %v3814_v62 = vld [vmem:[%s5229_s6 + $0x40] ss:$24 sps:$4 sm:$0xff]   ;;  %v3822_v63 = vld [vmem:[%s5229_s6 + $0x74] ss:$24 sps:$4 sm:$0xff]  }
 0x375   : > { %1444 = vmatprep.subr.bf16.mxu0 %v3796_v33  ;;  %v3853_v61 = vld [vmem:[%s5229_s6 + $0x12c] ss:$24 sps:$4 sm:$0xff]   ;;  %v3855_v0 = vld [vmem:[%s5229_s6 + $0x128] ss:$24 sps:$4 sm:$0xff]   ;;  %v3856_v1 = vld [vmem:[%s5229_s6 + $0x15c] ss:$24 sps:$4 sm:$0xff]  }
 0x376   : > { %v3820_v2 = vld [vmem:[%s5229_s6 + $0x70] ss:$24 sps:$4 sm:$0xff]   ;;  %v3828_v3 = vld [vmem:[%s5229_s6 + $0xa4] ss:$24 sps:$4 sm:$0xff]   ;;  %v3826_v5 = vld [vmem:[%s5229_s6 + $0xa0] ss:$24 sps:$4 sm:$0xff]  }
 0x377   : > { %1486 = vmatpush1.bf16.msra.mxu1 %v3831_v45  ;;  %v3858_v4 = vld [vmem:[%s5229_s6 + $0x158] ss:$24 sps:$4 sm:$0xff]   ;;  %v3834_v6 = vld [vmem:[%s5229_s6 + $0xd4] ss:$24 sps:$4 sm:$0xff]   ;;  %v3840_v8 = vld [vmem:[%s5229_s6 + $0x104] ss:$24 sps:$4 sm:$0xff]  }
 0x378   : > { %1445 = vmatpush1.bf16.msra.mxu0 %v3798_v34  ;;  %1487 = vmatprep.subr.bf16.mxu1 %v3835_v46  ;;  %v3832_v7 = vld [vmem:[%s5229_s6 + $0xd0] ss:$24 sps:$4 sm:$0xff]   ;;  %v3838_v9 = vld [vmem:[%s5229_s6 + $0x100] ss:$24 sps:$4 sm:$0xff]   ;;  %v3846_v10 = vld [vmem:[%s5229_s6 + $0x134] ss:$24 sps:$4 sm:$0xff]  }
 0x379   : > { %1446 = vmatprep.subr.bf16.mxu0 %v3799_v35  ;;  %v3844_v11 = vld [vmem:[%s5229_s6 + $0x130] ss:$24 sps:$4 sm:$0xff]   ;;  %v3852_v12 = vld [vmem:[%s5229_s6 + $0x164] ss:$24 sps:$4 sm:$0xff]   ;;  %v3850_v13 = vld [vmem:[%s5229_s6 + $0x160] ss:$24 sps:$4 sm:$0xff]  }
 0x37a   : > { %v1174_v17 = vsub.s32 1, %v5331_v16  ;;  %v1166_v18 = vld [vmem:[%s5237_s9] sm:$0x3f]  ;;  %v1170_v20 = vsub.s32 0, %v5331_v16  ;;  %v1178_v30 = vsub.s32 2, %v5331_v16  ;;  %v1182_v35 = vsub.s32 3, %v5331_v16 }
 0x37b   : > { %1488 = vmatpush1.bf16.msra.mxu1 %v3837_v51  ;;  %vm1697_vm1 = vcmask 1043456   ;;  %vm1667_vm2 = vcmask 64512   ;;  %s5726_s20 = sld [smem:[#allocation34_spill]] }
 0x37c   : > { %1447 = vmatpush1.bf16.msra.mxu0 %v3801_v36  ;;  %1489 = vmatprep.subr.bf16.mxu1 %v3841_v52  ;;  %v1175_v19 = vrot.slane %v1166_v18, %v1174_v17  ;;  %v1171_v25 = vrot.slane %v1166_v18, %v1170_v20  ;;  %v1179_v33 = vrot.slane %v1166_v18, %v1178_v30 }
 0x37d   : > { %1448 = vmatprep.subr.bf16.mxu0 %v3802_v39  ;;  %v1183_v40 = vrot.slane %v1166_v18, %v1182_v35 }
 0x37f   : > { %1490 = vmatpush1.bf16.msra.mxu1 %v3843_v55 }
 0x380   : > { %1449 = vmatpush1.bf16.msra.mxu0 %v3804_v42  ;;  %1491 = vmatprep.subr.bf16.mxu1 %v3847_v57  ;;  %v1190_v57 = vsub.s32 5, %v5331_v16 }
 0x381   : > { %1450 = vmatprep.subr.bf16.mxu0 %v3805_v43  ;;  %p3379_p0 = scmp.ne.s32.totalorder %s5726_s20, 1 }
 0x382   : > { %vm4578_vm3 = vmmov (!%p3379_p0), 0   ;;  %s5727_s30 = sld [smem:[#allocation56_spill]] (!%p3379_p0)  ;;  %vm2702_vm4 = vcmask (!%p3379_p0), 1041409   ;;  %s5728_s14 = sld [smem:[#allocation57_spill]] (!%p3379_p0) }
 0x383   : > { %1492 = vmatpush1.bf16.msra.mxu1 %v3849_v60  ;;  %v1191_v60 = vrot.slane %v1166_v18, %v1190_v57 }
 0x384   : > { %1451 = vmatpush1.bf16.msra.mxu0 %v3807_v47  ;;  %1493 = vmatprep.subr.bf16.mxu1 %v3853_v61 }
 0x385   : > { %1452 = vmatprep.subr.bf16.mxu0 %v3808_v48  ;;  %v1186_v48 = vsub.s32 4, %v5331_v16 }
 0x387   : > { %1494 = vmatpush1.bf16.msra.mxu1 %v3855_v0 }
 0x388   : > { %1453 = vmatpush1.bf16.msra.mxu0 %v3810_v49  ;;  %1495 = vmatprep.subr.bf16.mxu1 %v3856_v1  ;;  %v5355_v49 = vrot.slane %v1166_v18, %v1186_v48 }
 0x389   : > { %1524 = vmatprep.subr.bf16.mxu0 %v3813_v54 }
 0x38b   : > { %1471 = vmatmul.mubr.bf16.vlgmr.msra.gmra.mrb[0].mxu0 %v1117_v56  ;;  %1496 = vmatpush1.bf16.msra.mxu1 %v3858_v4 }
 0x38c   : > { %1525 = vmatpush1.bf16.msra.mxu0 %v3811_v58  ;;  %1556 = vmatprep.mubr.bf16.mxu0 %v4574_v28 }
 0x38d   : > { %1526 = vmatprep.subr.bf16.mxu0 %v3816_v59  ;;  %3479 = vmatprep.subr.bf16.mxu1 %v4575_v14 }
 0x38e   : > { %1514 = vmatmul.mubr.bf16.vlgmr.msra.gmra.mrb[0].mxu1 %v1117_v56 }
 0x38f   : > { %3481 = vmatprep.mubr.msk.bf16.mxu1 %vm4576_vm0, %v4575_v14 }
 0x390   : > { %1527 = vmatpush1.bf16.msra.mxu0 %v3814_v62 }
 0x391   : > { %1528 = vmatprep.subr.bf16.mxu0 %v3822_v63 }
 0x394   : > { %1529 = vmatpush1.bf16.msra.mxu0 %v3820_v2 }
 0x395   : > { %1530 = vmatprep.subr.bf16.mxu0 %v3828_v3  ;;  %v3303_v3 = vld [vmem:[#allocation6] ss:$0 sm:$0xff] }
 0x398   : > { %1531 = vmatpush1.bf16.msra.mxu0 %v3826_v5 }
 0x399   : > { %1532 = vmatprep.subr.bf16.mxu0 %v3834_v6 }
 0x39c   : > { %1533 = vmatpush1.bf16.msra.mxu0 %v3832_v7 }
 0x39d   : > { %1534 = vmatprep.subr.bf16.mxu0 %v3840_v8 }
 0x3a0   : > { %1535 = vmatpush1.bf16.msra.mxu0 %v3838_v9 }
 0x3a1   : > { %1536 = vmatprep.subr.bf16.mxu0 %v3846_v10 }
 0x3a4   : > { %1537 = vmatpush1.bf16.msra.mxu0 %v3844_v11  ;;  %v5369_v11 = vld [vmem:[#allocation6 + $0x1] ss:$0 sm:$0xff] }
 0x3a5   : > { %1538 = vmatprep.subr.bf16.mxu0 %v3852_v12 }
 0x3a8   : > { %1539 = vmatpush1.bf16.msra.mxu0 %v3850_v13 }
 0x3a9   : > { %3503 = vmatprep.subr.bf16.mxu0 %v4575_v14 }
 0x3ab   : > { %1557 = vmatmul.mubr.bf16.vlgmr.msra.gmra.mrb[4].mxu0 %v1117_v56 }
 0x3ac   : > { %3505 = vmatprep.mubr.msk.bf16.mxu0 %vm4576_vm0, %v4575_v14 }
 0x45e   : > { %v1472_v21 = vpop.f32.mrb[0].mxu0 }
 0x45f   : > { %v1474_v22 = vpop.f32.mrb[1].mxu0  ;;  %v1473_v29 = vadd.f32 %v1472_v21, %v1171_v25 }
 0x460   : > { %v1475_v23 = vadd.f32 %v1474_v22, %v1175_v19  ;;  %v1476_v24 = vpop.f32.mrb[2].mxu0 }
 0x461   : > { %v1478_v26 = vpop.f32.mrb[3].mxu0  ;;  %v1567_v32 = vpack.c.bf16 %v1473_v29, %v1473_v29  ;;  %v1515_v36 = vpop.f32.mrb[0].mxu1  ;;  %v1477_v37 = vadd.f32 %v1476_v24, %v1171_v25 }
 0x462   : > { %v1569_v27 = vpack.c.bf16 %v1475_v23, %v1475_v23  ;;  %v1479_v31 = vadd.f32 %v1478_v26, %v1175_v19  ;;  %v1516_v38 = vadd.f32 %v1515_v36, %v1179_v33  ;;  %v1517_v39 = vpop.f32.mrb[1].mxu1 }
 0x463   : > { %v1519_v41 = vpop.f32.mrb[2].mxu1  ;;  %v1568_v46 = vpack.c.bf16 %v1477_v37, %v1477_v37  ;;  %v1518_v55 = vadd.f32 %v1517_v39, %v1183_v40 }
 0x464   : > { %3480 = vmatpush3.bf16.xpose.msra.mxu1 %v1569_v27  ;;  %v1570_v34 = vpack.c.bf16 %v1479_v31, %v1479_v31  ;;  %v1692_v42 = vpack.c.bf16 %v1516_v38, %v1516_v38  ;;  %v5346_v43 = vadd.f32 %v1519_v41, %v1179_v33  ;;  %v1521_v44 = vpop.f32.mrb[3].mxu1 }
 0x465   : > { %3485 = vmatprep.subr.bf16.mxu1 %v4575_v14  ;;  %v5348_v45 = vadd.f32 %v1521_v44, %v1183_v40  ;;  %v1804_v56 = vpack.c.bf16 %v1518_v55, %v1518_v55 }
 0x466   : > { %v1699_v47 = vsel %vm1697_vm1, %v1692_v42, 0 }
 0x46b   : > { %3482 = vmatmul.mubr.bf16.vlgmr.msra.gmra.mrb[4].mxu1 %v1567_v32 }
 0x46c   : > { %3486 = vmatpush3.bf16.xpose.msra.mxu1 %v1570_v34  ;;  %3487 = vmatprep.mubr.msk.bf16.mxu1 %vm4576_vm0, %v4575_v14 }
 0x46d   : > { %3491 = vmatprep.subr.bf16.mxu1 %v4575_v14 }
 0x473   : > { %3488 = vmatmul.mubr.bf16.vlgmr.msra.gmra.mrb[8].mxu1 %v1568_v46 }
 0x474   : > { %3492 = vmatpush3.bf16.msra.mxu1 %v1699_v47  ;;  %3493 = vmatprep.mubr.msk.bf16.mxu1 %vm4576_vm0, %v4575_v14 }
 0x475   : > { %3497 = vmatprep.subr.bf16.mxu1 %v4575_v14 }
 0x47e   : > { %v1558_v51 = vpop.f32.mrb[4].mxu0 }
 0x47f   : > { %v1559_v52 = vadd.f32 %v1558_v51, %v5355_v49  ;;  %v1560_v58 = vpop.f32.mrb[5].mxu0 }
 0x480   : > { %v5362_v59 = vpop.f32.mrb[6].mxu0  ;;  %v1561_v62 = vadd.f32 %v1560_v58, %v1191_v60 }
 0x481   : > { %v1806_v54 = vpack.c.bf16 %v1559_v52, %v1559_v52  ;;  %v1564_v61 = vpop.f32.mrb[7].mxu0  ;;  %v1693_v52 = vpack.c.bf16 %v5346_v43, %v5346_v43  ;;  %v1563_v58 = vadd.f32 %v5362_v59, %v5355_v49 }
 0x482   : > { %v5364_v63 = vadd.f32 %v1564_v61, %v1191_v60  ;;  %v1916_v0 = vpack.c.bf16 %v1561_v62, %v1561_v62 }
 0x483   : > { %3504 = vmatpush3.bf16.xpose.msra.mxu0 %v1806_v54  ;;  %v1807_v62 = vpack.c.bf16 %v1563_v58, %v1563_v58 }
 0x484   : > { %3515 = vmatprep.subr.bf16.mxu0 %v4575_v14  ;;  %v1922_v1 = vsel %vm1697_vm1, %v1916_v0, 0  ;;  %v1917_v43 = vpack.c.bf16 %v5364_v63, %v5364_v63  ;;  %v1805_v0 = vpack.c.bf16 %v5348_v45, %v5348_v45 }
 0x486   : > { %v1968_v49 = vsel %vm1697_vm1, %v1917_v43, 0 }
 0x48a   : > { %3506 = vmatmul.mubr.bf16.vlgmr.msra.gmra.mrb[8].mxu0 %v1804_v56  ;;  %v1745_v56 = vsel %vm1697_vm1, %v1693_v52, 0  ;;  %v3864_v52 = vld [vmem:[%s5239_s11 + $0x28] sm:$0xff]  }
 0x48b   : > { %3517 = vmatprep.mubr.msk.bf16.mxu0 %vm4576_vm0, %v4575_v14  ;;  %3516 = vmatpush3.bf16.msra.mxu0 %v1922_v1 }
 0x48c   : > { %3527 = vmatprep.subr.bf16.mxu0 %v4575_v14 }
 0x53e   : > { %v1605_v2 = vpop.f32.mrb[4].mxu1 }
 0x53f   : > { %v1651_v4 = vmul.f32 0.125, %v1605_v2  ;;  %v3483_v5 = vpop.f32.mrb[5].mxu1 }
 0x540   : > { %v1608_v6 = vpop.f32.mrb[6].mxu1 }
 0x541   : > { %v3484_v7 = vpop.f32.mrb[7].mxu1  ;;  %v1665_v8 = vadd.f32 %v3303_v3, %v1651_v4 }
 0x543   : > { %v1668_v9 = vsel %vm1667_vm2, %v1665_v8, -inf }
 0x544   : > { %1669 = vmax.xlane.f32.xlu0 %v1668_v9 }
 0x546   : > { %v1645_v10 = vpop.f32.mrb[8].mxu1 }
 0x547   : > { %v1652_v12 = vmul.f32 0.125, %v1645_v10  ;;  %v3489_v13 = vpop.f32.mrb[9].mxu1 }
 0x548   : > { %v1648_v15 = vpop.f32.mrb[10].mxu1 }
 0x549   : > { %v3490_v18 = vpop.f32.mrb[11].mxu1  ;;  %v1666_v19 = vadd.f32 %v5369_v11, %v1652_v12 }
 0x54b   : > { %v1671_v21 = vsel %vm1667_vm2, %v1666_v19, -inf }
 0x54c   : > { %1672 = vmax.xlane.f32.xlu0 %v1671_v21 }
 0x55d   : > { %v1842_v22 = vpop.f32.mrb[8].mxu0 }
 0x55e   : > { %v1888_v23 = vmul.f32 0.125, %v1842_v22  ;;  %v3507_v24 = vpop.f32.mrb[9].mxu0 }
 0x55f   : > { %v1845_v25 = vpop.f32.mrb[10].mxu0 }
 0x560   : > { %v1890_v26 = vadd.f32 %v3303_v3, %v1888_v23  ;;  %v3508_v27 = vpop.f32.mrb[11].mxu0 }
 0x562   : > { %v1892_v29 = vsel %vm1667_vm2, %v1890_v26, -inf }
 0x563   : > { %1893 = vmax.xlane.f32.xlu0 %v1892_v29 }
 0x5d1   : > { %v1670_v30 = vpop.xlane.xlu0 %1669 }
 0x5d2   : > { %v1674_v31 = vsub.f32 %v1665_v8, %v1670_v30 }
 0x5d4   : > { %v1676_v32 = vmul.f32 1.442695, %v1674_v31 }
 0x5d6   : > { %3915 = vpow2.f32 %v1676_v32 }
 0x5d9   : > { %v1673_v33 = vpop.xlane.xlu0 %1672 }
 0x5da   : > { %v1675_v34 = vsub.f32 %v1666_v19, %v1673_v33  ;;  %v3868_v33 = vld [vmem:[%s5239_s11 + $0x48] sm:$0xff]  }
 0x5dc   : > { %v1678_v35 = vmul.f32 1.442695, %v1675_v34  ;;  %v3869_v34 = vld [vmem:[%s5239_s11 + $0x50] sm:$0xff]  }
 0x5de   : > { %3917 = vpow2.f32 %v1678_v35  ;;  %v3870_v35 = vld [vmem:[%s5239_s11 + $0x58] sm:$0xff]  }
 0x5e0   : > { %v3916_v36 = vpop.eup %3915 }
 0x5e1   : > { %v1680_v37 = vsel %vm1667_vm2, %v3916_v36, 0.0 }
 0x5e2   : > { %1681 = vadd.xlane.f32.xlu1 %v1680_v37  ;;  %v3872_v37 = vld [vmem:[%s5239_s11 + $0x68] sm:$0xff]  }
 0x5e8   : > { %v3918_v38 = vpop.eup %3917 }
 0x5e9   : > { %v1683_v39 = vsel %vm1667_vm2, %v3918_v38, 0.0 }
 0x5ea   : > { %1684 = vadd.xlane.f32.xlu1 %v1683_v39 }
 0x5f0   : > { %v1894_v40 = vpop.xlane.xlu0 %1893 }
 0x5f1   : > { %v1898_v41 = vsub.f32 %v1890_v26, %v1894_v40 }
 0x5f3   : > { %v1900_v42 = vmul.f32 1.442695, %v1898_v41 }
 0x5f5   : > { %3919 = vpow2.f32 %v1900_v42  ;;  %v3859_v42 = vld [vmem:[%s5239_s11] sm:$0xff]  }
 0x5ff   : > { %v3920_v44 = vpop.eup %3919 }
 0x600   : > { %v1904_v46 = vsel %vm1667_vm2, %v3920_v44, 0.0 }
 0x601   : > { %1905 = vadd.xlane.f32.xlu0 %v1904_v46  ;;  %v3860_v46 = vld [vmem:[%s5239_s11 + $0x8] sm:$0xff]  }
 0x66f   : > { %v1682_v47 = vpop.xlane.xlu1 %1681 }
 0x670   : > { %3921 = vrcp.f32 %v1682_v47  ;;  %v3861_v47 = vld [vmem:[%s5239_s11 + $0x10] sm:$0xff]  }
 0x677   : > { %v1685_v48 = vpop.xlane.xlu1 %1684 }
 0x678   : > { %3923 = vrcp.f32 %v1685_v48  ;;  %v3862_v48 = vld [vmem:[%s5239_s11 + $0x18] sm:$0xff]  }
 0x67a   : > { %v3922_v51 = vpop.eup %3921 }
 0x67b   : > { %v1688_v54 = vmul.f32 %v3922_v51, %v3916_v36  ;;  %v3871_v36 = vld [vmem:[%s5239_s11 + $0x60] sm:$0xff]  }
 0x67c   : > { %v3863_v51 = vld [vmem:[%s5239_s11 + $0x20] sm:$0xff]  }
 0x67d   : > { %v1690_v55 = vpack.c.bf16 %v1688_v54, %v1688_v54  ;;  %v3865_v54 = vld [vmem:[%s5239_s11 + $0x30] sm:$0xff]  }
 0x67f   : > { %3494 = vmatmul.mubr.msk.bf16.vlgmr.msra.gmra.mrb[12].mxu1 %vm1667_vm2, %v1690_v55  ;;  %v3866_v55 = vld [vmem:[%s5239_s11 + $0x38] sm:$0xff]  }
 0x680   : > { %3498 = vmatpush3.bf16.msra.mxu1 %v1745_v56  ;;  %3499 = vmatprep.mubr.msk.bf16.mxu1 %vm4576_vm0, %v4575_v14  ;;  %v3874_v56 = vld [vmem:[%s5239_s11 + $0x78] sm:$0xff]  }
 0x681   : > { %3509 = vmatprep.subr.bf16.mxu1 %v4575_v14 }
 0x682   : > { %v3924_v57 = vpop.eup %3923 }
 0x683   : > { %v1689_v60 = vmul.f32 %v3924_v57, %v3918_v38  ;;  %v3873_v38 = vld [vmem:[%s5239_s11 + $0x70] sm:$0xff]  }
 0x685   : > { %v1691_v61 = vpack.c.bf16 %v1689_v60, %v1689_v60 }
 0x687   : > { %3500 = vmatmul.mubr.msk.bf16.vlgmr.msra.gmra.mrb[16].mxu1 %vm1667_vm2, %v1691_v61 }
 0x688   : > { %3511 = vmatprep.mubr.msk.bf16.mxu1 %vm4576_vm0, %v4575_v14 }
 0x689   : > { %3510 = vmatpush3.bf16.xpose.msra.mxu1 %v1807_v62 }
 0x68a   : > { %3521 = vmatprep.subr.bf16.mxu1 %v4575_v14 }
 0x68e   : > { %v1906_v1 = vpop.xlane.xlu0 %1905 }
 0x68f   : > { %3925 = vrcp.f32 %v1906_v1 }
 0x690   : > { %3512 = vmatmul.mubr.bf16.vlgmr.msra.gmra.mrb[20].mxu1 %v1805_v0 }
 0x691   : > { %3522 = vmatpush3.bf16.msra.mxu1 %v1968_v49  ;;  %3523 = vmatprep.mubr.msk.bf16.mxu1 %vm4576_vm0, %v4575_v14 }
 0x692   : > { %3547 = vmatprep.subr.bf16.mxu1 %v4575_v14 }
 0x699   : > { %v3926_v59 = vpop.eup %3925 }
 0x69a   : > { %v1912_v2 = vmul.f32 %v3926_v59, %v3920_v44  ;;  %v3341_v59 = vld [vmem:[%s893_s12] ss:$0 sm:$0xff] }
 0x69c   : > { %v1914_v3 = vpack.c.bf16 %v1912_v2, %v1912_v2 }
 0x69e   : > { %3518 = vmatmul.mubr.msk.bf16.vlgmr.msra.gmra.mrb[12].mxu0 %vm1667_vm2, %v1914_v3 }
 0x69f   : > { %3543 = vmatprep.mubr.msk.bf16.mxu0 %vm4576_vm0, %v4575_v14 }
 0x752   : > { %v5401_v45 = vpop.f32.mrb[12].mxu1 }
 0x753   : > { %v3495_v63 = vpop.f32.mrb[13].mxu1 }
 0x754   : > { %v1738_v4 = vpop.f32.mrb[14].mxu1 }
 0x755   : > { %v3496_v5 = vpop.f32.mrb[15].mxu1 }
 0x75a   : > { %v5403_v6 = vpop.f32.mrb[16].mxu1 }
 0x75b   : > { %v1787_v7 = vpack.c.bf16 %v5403_v6, %v5401_v45  ;;  %v3501_v8 = vpop.f32.mrb[17].mxu1 }
 0x75c   : > { %v1784_v9 = vpop.f32.mrb[18].mxu1  ;;  %v3875_v8 = vld [vmem:[%s5244_s29] ss:$8 sps:$4 sm:$0xff]  }
 0x75d   : > { %v3502_v10 = vpop.f32.mrb[19].mxu1  ;;  %v3877_v9 = vld [vmem:[%s5244_s29 + $0x4] ss:$8 sps:$4 sm:$0xff]  }
 0x75e   : > { %v3880_v10 = vld [vmem:[%s5244_s29 + $0x14] ss:$8 sps:$4 sm:$0xff]  }
 0x763   : > { %v1882_v12 = vpop.f32.mrb[20].mxu1 }
 0x764   : > { %v1889_v13 = vmul.f32 0.125, %v1882_v12  ;;  %v3513_v15 = vpop.f32.mrb[21].mxu1  ;;  %v3878_v12 = vld [vmem:[%s5244_s29 + $0x10] ss:$8 sps:$4 sm:$0xff]  }
 0x765   : > { %v1885_v18 = vpop.f32.mrb[22].mxu1 }
 0x766   : > { %v3514_v19 = vpop.f32.mrb[23].mxu1  ;;  %v1891_v21 = vadd.f32 %v5369_v11, %v1889_v13  ;;  %v3867_v11 = vld [vmem:[%s5239_s11 + $0x40] sm:$0xff]  }
 0x767   : > { %3528 = vmatpush3.bf16.msra.mxu0 %v3867_v11  ;;  %v3893_v11 = vld [vmem:[%s5244_s29 + $0x60] ss:$8 sps:$4 sm:$0xff]  }
 0x768   : > { %v1895_v22 = vsel %vm1667_vm2, %v1891_v21, -inf  ;;  %3529 = vmatprep.subr.bf16.mxu0 %v4575_v14 }
 0x769   : > { %1896 = vmax.xlane.f32.xlu1 %v1895_v22 }
 0x76b   : > { %3530 = vmatpush3.bf16.msra.mxu0 %v3868_v33  ;;  %v3898_v33 = vld [vmem:[%s5244_s29 + $0x74] ss:$8 sps:$4 sm:$0xff]  }
 0x76c   : > { %3531 = vmatprep.subr.bf16.mxu0 %v4575_v14 }
 0x76f   : > { %3532 = vmatpush3.bf16.msra.mxu0 %v3869_v34  ;;  %v3896_v34 = vld [vmem:[%s5244_s29 + $0x70] ss:$8 sps:$4 sm:$0xff]  }
 0x770   : > { %3533 = vmatprep.subr.bf16.mxu0 %v4575_v14 }
 0x771   : > { %v5409_v23 = vpop.f32.mrb[12].mxu0 }
 0x772   : > { %v3519_v24 = vpop.f32.mrb[13].mxu0 }
 0x773   : > { %v1961_v25 = vpop.f32.mrb[14].mxu0  ;;  %3534 = vmatpush3.bf16.msra.mxu0 %v3870_v35  ;;  %v3881_v24 = vld [vmem:[%s5244_s29 + $0x20] ss:$8 sps:$4 sm:$0xff]  }
 0x774   : > { %v3520_v26 = vpop.f32.mrb[15].mxu0  ;;  %3535 = vmatprep.subr.bf16.mxu0 %v4575_v14  ;;  %v3886_v25 = vld [vmem:[%s5244_s29 + $0x34] ss:$8 sps:$4 sm:$0xff]  }
 0x775   : > { %v3884_v26 = vld [vmem:[%s5244_s29 + $0x30] ss:$8 sps:$4 sm:$0xff]  }
 0x777   : > { %3536 = vmatpush3.bf16.msra.mxu0 %v3871_v36 }
 0x778   : > { %3537 = vmatprep.subr.bf16.mxu0 %v4575_v14 }
 0x77b   : > { %3538 = vmatpush3.bf16.msra.mxu0 %v3872_v37 }
 0x77c   : > { %3539 = vmatprep.subr.bf16.mxu0 %v4575_v14 }
 0x77f   : > { %3540 = vmatpush3.bf16.msra.mxu0 %v3873_v38 }
 0x780   : > { %3541 = vmatprep.subr.bf16.mxu0 %v4575_v14 }
 0x783   : > { %3542 = vmatpush3.bf16.msra.mxu0 %v3874_v56 }
 0x784   : > { %2367 = vmatprep.subr.bf16.mxu0 %v3877_v9 }
 0x7f6   : > { %v1897_v27 = vpop.xlane.xlu1 %1896 }
 0x7f7   : > { %v1899_v29 = vsub.f32 %v1891_v21, %v1897_v27  ;;  %v3889_v27 = vld [vmem:[%s5244_s29 + $0x44] ss:$8 sps:$4 sm:$0xff]  }
 0x7f9   : > { %v1902_v30 = vmul.f32 1.442695, %v1899_v29  ;;  %v3887_v29 = vld [vmem:[%s5244_s29 + $0x40] ss:$8 sps:$4 sm:$0xff]  }
 0x7fb   : > { %3927 = vpow2.f32 %v1902_v30  ;;  %v3892_v30 = vld [vmem:[%s5244_s29 + $0x54] ss:$8 sps:$4 sm:$0xff]  }
 0x805   : > { %v3928_v31 = vpop.eup %3927 }
 0x806   : > { %v1907_v32 = vsel %vm1667_vm2, %v3928_v31, 0.0 }
 0x807   : > { %1908 = vadd.xlane.f32.xlu1 %v1907_v32  ;;  %v3895_v32 = vld [vmem:[%s5244_s29 + $0x64] ss:$8 sps:$4 sm:$0xff]  }
 0x894   : > { %v1909_v39 = vpop.xlane.xlu1 %1908 }
 0x895   : > { %3929 = vrcp.f32 %v1909_v39 }
 0x89f   : > { %v3930_v40 = vpop.eup %3929 }
 0x8a0   : > { %v1913_v41 = vmul.f32 %v3930_v40, %v3928_v31  ;;  %v3890_v31 = vld [vmem:[%s5244_s29 + $0x50] ss:$8 sps:$4 sm:$0xff]  }
 0x8a2   : > { %v1915_v44 = vpack.c.bf16 %v1913_v41, %v1913_v41 }
 0x8a4   : > { %3524 = vmatmul.mubr.msk.bf16.vlgmr.msra.gmra.mrb[24].mxu1 %vm1667_vm2, %v1915_v44 }
 0x8a5   : > { %3548 = vmatpush3.bf16.msra.mxu1 %v3859_v42  ;;  %3563 = vmatprep.mubr.msk.bf16.mxu1 %vm4576_vm0, %v4575_v14  ;;  %v3342_v42 = vld [vmem:[%s901_s1] ss:$0 sm:$0xff] }
 0x8a6   : > { %3549 = vmatprep.subr.bf16.mxu1 %v4575_v14 }
 0x8a9   : > { %3550 = vmatpush3.bf16.msra.mxu1 %v3860_v46 }
 0x8aa   : > { %3551 = vmatprep.subr.bf16.mxu1 %v4575_v14 }
 0x8ad   : > { %3552 = vmatpush3.bf16.msra.mxu1 %v3861_v47 }
 0x8ae   : > { %3553 = vmatprep.subr.bf16.mxu1 %v4575_v14 }
 0x8b1   : > { %3554 = vmatpush3.bf16.msra.mxu1 %v3862_v48 }
 0x8b2   : > { %3555 = vmatprep.subr.bf16.mxu1 %v4575_v14 }
 0x8b5   : > { %3556 = vmatpush3.bf16.msra.mxu1 %v3863_v51  ;;  %v3343_v51 = vld [vmem:[%s909_s21] ss:$0 sm:$0xff] }
 0x8b6   : > { %3557 = vmatprep.subr.bf16.mxu1 %v4575_v14 }
 0x8b9   : > { %3558 = vmatpush3.bf16.msra.mxu1 %v3864_v52 }
 0x8ba   : > { %3559 = vmatprep.subr.bf16.mxu1 %v4575_v14 }
 0x8bd   : > { %3560 = vmatpush3.bf16.msra.mxu1 %v3865_v54 }
 0x8be   : > { %3561 = vmatprep.subr.bf16.mxu1 %v4575_v14 }
 0x8c1   : > { %3562 = vmatpush3.bf16.msra.mxu1 %v3866_v55 }
 0x8c4   : > { %3564 = vmatmul.mubr.bf16.vlgmr.msra.gmra.mrb[28].mxu1 %v1787_v7 }
 0x977   : > { %v2004_v57 = vpop.f32.mrb[24].mxu1 }
 0x978   : > { %v2010_v58 = vpack.c.bf16 %v2004_v57, %v5409_v23  ;;  %v3525_v60 = vpop.f32.mrb[25].mxu1  ;;  %v3883_v23 = vld [vmem:[%s5244_s29 + $0x24] ss:$8 sps:$4 sm:$0xff]  }
 0x979   : > { %v2007_v61 = vpop.f32.mrb[26].mxu1  ;;  %v3899_v57 = vld [vmem:[%s5246_s2 + $0x40] sm:$0xff]   ;;  %v3901_v60 = vld [vmem:[%s5246_s2 + $0x48] sm:$0xff]  }
 0x97a   : > { %v3526_v62 = vpop.f32.mrb[27].mxu1  ;;  %3544 = vmatmul.mubr.bf16.vlgmr.msra.gmra.mrb[16].mxu0 %v2010_v58  ;;  %v3900_v58 = vld [vmem:[%s5246_s2] sm:$0xff]   ;;  %3439 = vmatprep.subr.bf16.mxu1 %v3899_v57  ;;  %v3902_v61 = vld [vmem:[%s5246_s2 + $0x8] sm:$0xff]  }
 0x97b   : > { %2399 = vmatprep.mubr.bf16.mxu0 %v4574_v28  ;;  %2368 = vmatpush1.bf16.msra.mxu0 %v3875_v8  ;;  %v3903_v62 = vld [vmem:[%s5246_s2 + $0x50] sm:$0xff]  }
 0x97c   : > { %2369 = vmatprep.subr.bf16.mxu0 %v3880_v10  ;;  %3440 = vmatpush3.bf16.msra.mxu1 %v3900_v58 }
 0x97d   : > { %3441 = vmatprep.subr.bf16.mxu1 %v3901_v60 }
 0x97f   : > { %2370 = vmatpush1.bf16.msra.mxu0 %v3878_v12 }
 0x980   : > { %2371 = vmatprep.subr.bf16.mxu0 %v3883_v23  ;;  %3442 = vmatpush3.bf16.msra.mxu1 %v3902_v61 }
 0x981   : > { %3443 = vmatprep.subr.bf16.mxu1 %v3903_v62  ;;  %v3360_v62 = vld [vmem:[%s935_s24] ss:$0 sm:$0xff] }
 0x983   : > { %2372 = vmatpush1.bf16.msra.mxu0 %v3881_v24 }
 0x984   : > { %2373 = vmatprep.subr.bf16.mxu0 %v3886_v25 }
 0x987   : > { %2374 = vmatpush1.bf16.msra.mxu0 %v3884_v26 }
 0x988   : > { %2375 = vmatprep.subr.bf16.mxu0 %v3889_v27 }
 0x98b   : > { %2376 = vmatpush1.bf16.msra.mxu0 %v3887_v29 }
 0x98c   : > { %2377 = vmatprep.subr.bf16.mxu0 %v3892_v30 }
 0x98f   : > { %2378 = vmatpush1.bf16.msra.mxu0 %v3890_v31 }
 0x990   : > { %2379 = vmatprep.subr.bf16.mxu0 %v3895_v32 }
 0x993   : > { %2380 = vmatpush1.bf16.msra.mxu0 %v3893_v11 }
 0x994   : > { %2381 = vmatprep.subr.bf16.mxu0 %v3898_v33 }
 0x997   : > { %v2199_v43 = vpop.f32.mrb[28].mxu1  ;;  %2382 = vmatpush1.bf16.msra.mxu0 %v3896_v34 }
 0x998   : > { %v3565_v0 = vpop.f32.mrb[29].mxu1 }
 0x999   : > { %v2202_v14 = vpop.f32.mrb[30].mxu1  ;;  %v3905_v0 = vld [vmem:[%s5246_s2 + $0x58] sm:$0xff]  }
 0x99a   : > { %v3566_v1 = vpop.f32.mrb[31].mxu1 }
 0x99b   : > { %v3907_v1 = vld [vmem:[%s5246_s2 + $0x60] sm:$0xff]  }
 0xa4d   : > { %v2110_v49 = vpop.f32.mrb[16].mxu0 }
 0xa4e   : > { %v2200_v2 = vadd.f32 %v2199_v43, %v2110_v49  ;;  %v3545_v3 = vpop.f32.mrb[17].mxu0  ;;  %v3904_v43 = vld [vmem:[%s5246_s2 + $0x10] sm:$0xff]   ;;  %v3908_v49 = vld [vmem:[%s5246_s2 + $0x20] sm:$0xff]  }
 0xa4f   : > { %v2113_v45 = vpop.f32.mrb[18].mxu0  ;;  %3444 = vmatpush3.bf16.msra.mxu1 %v3904_v43  ;;  %v3911_v3 = vld [vmem:[%s5246_s2 + $0x70] sm:$0xff]  }
 0xa50   : > { %v2213_v63 = vadd.f32 %v3341_v59, %v2200_v2  ;;  %v2203_v4 = vadd.f32 %v2202_v14, %v2113_v45  ;;  %v3546_v5 = vpop.f32.mrb[19].mxu0  ;;  %v3906_v14 = vld [vmem:[%s5246_s2 + $0x18] sm:$0xff]   ;;  %3445 = vmatprep.subr.bf16.mxu1 %v3905_v0  ;;  %v3910_v2 = vld [vmem:[%s5246_s2 + $0x28] sm:$0xff]   ;;  %v3912_v45 = vld [vmem:[%s5246_s2 + $0x30] sm:$0xff]  }
 0xa51   : > { %v2275_v5 = vld [vmem:[%s5264_s23] sm:$0x3] }
 0xa52   : > { %v2214_v6 = vadd.f32 %v3341_v59, %v2203_v4  ;;  %v2215_v28 = vadd.f32 %v2213_v63, %v5293_v50  ;;  %v3909_v59 = vld [vmem:[%s5246_s2 + $0x68] sm:$0xff]   ;;  %v3913_v63 = vld [vmem:[%s5246_s2 + $0x78] sm:$0xff]  }
 0xa53   : > { %3446 = vmatpush3.bf16.msra.mxu1 %v3906_v14  ;;  %v3914_v4 = vld [vmem:[%s5246_s2 + $0x38] sm:$0xff]  }
 0xa54   : > { %2219 = vadd.xlane.f32.xlu0 %v2215_v28  ;;  %v2216_v7 = vadd.f32 %v2214_v6, %v5297_v53  ;;  %3447 = vmatprep.subr.bf16.mxu1 %v3907_v1  ;;  %v2280_v6 = vrot.slane %v2275_v5, %v1170_v20 }
 0xa56   : > { %2221 = vadd.xlane.f32.xlu1 %v2216_v7 }
 0xa57   : > { %3448 = vmatpush3.bf16.msra.mxu1 %v3908_v49 }
 0xa58   : > { %3449 = vmatprep.subr.bf16.mxu1 %v3909_v59 }
 0xa5b   : > { %3450 = vmatpush3.bf16.msra.mxu1 %v3910_v2 }
 0xa5c   : > { %3451 = vmatprep.subr.bf16.mxu1 %v3911_v3 }
 0xa5f   : > { %3452 = vmatpush3.bf16.msra.mxu1 %v3912_v45 }
 0xa60   : > { %3453 = vmatprep.subr.bf16.mxu1 %v3913_v63 }
 0xa63   : > { %3454 = vmatpush3.bf16.msra.mxu1 %v3914_v4 }
 0xae1   : > { %v2220_v13 = vpop.xlane.xlu0 %2219 }
 0xae2   : > { %v2224_v15 = vmul.f32 0.0078125, %v2220_v13 }
 0xae3   : > { %v2222_v18 = vpop.xlane.xlu1 %2221 }
 0xae4   : > { %v2226_v50 = vsub.f32 %v2215_v28, %v2224_v15  ;;  %v2225_v53 = vmul.f32 0.0078125, %v2222_v18  ;;  %v2284_v28 = vrot.slane %v2275_v5, %v1174_v17 }
 0xae6   : > { %v2227_v19 = vsub.f32 %v2216_v7, %v2225_v53  ;;  %v2228_v21 = vmul.f32 %v2226_v50, %v2226_v50 }
 0xae8   : > { %2230 = vadd.xlane.f32.xlu0 %v2228_v21  ;;  %v2229_v22 = vmul.f32 %v2227_v19, %v2227_v19 }
 0xaea   : > { %2232 = vadd.xlane.f32.xlu1 %v2229_v22 }
 0xb75   : > { %v2231_v35 = vpop.xlane.xlu0 %2230 }
 0xb76   : > { %v2234_v36 = vmul.f32 0.0078125, %v2231_v35 }
 0xb77   : > { %v2233_v37 = vpop.xlane.xlu1 %2232 }
 0xb78   : > { %v2236_v38 = vadd.f32 1e-12, %v2234_v36  ;;  %v2235_v39 = vmul.f32 0.0078125, %v2233_v37 }
 0xb7a   : > { %3931 = vrsqrt.f32 %v2236_v38  ;;  %v2237_v40 = vadd.f32 1e-12, %v2235_v39 }
 0xb7c   : > { %3933 = vrsqrt.f32 %v2237_v40 }
 0xb84   : > { %v3932_v41 = vpop.eup %3931 }
 0xb85   : > { %v2240_v44 = vmul.f32 %v3932_v41, %v2226_v50 }
 0xb86   : > { %v3934_v46 = vpop.eup %3933 }
 0xb87   : > { %v2241_v47 = vmul.f32 %v3934_v46, %v2227_v19  ;;  %v2248_v48 = vmul.f32 %v3342_v42, %v2240_v44 }
 0xb89   : > { %v2249_v52 = vmul.f32 %v3342_v42, %v2241_v47  ;;  %v5474_v54 = vadd.f32 %v3343_v51, %v2248_v48 }
 0xb8b   : > { %v5476_v55 = vadd.f32 %v3343_v51, %v2249_v52 }
 0xb8d   : > { %v2258_v56 = vpack.c.bf16 %v5476_v55, %v5474_v54 }
 0xb8f   : > { %2400 = vmatmul.mubr.bf16.vlgmr.msra.gmra.mrb[20].mxu0 %v2258_v56 }
 0xc62   : > { %v2401_v7 = vpop.f32.mrb[20].mxu0 }
 0xc63   : > { %v2402_v8 = vadd.f32 %v2401_v7, %v2280_v6  ;;  %v2403_v9 = vpop.f32.mrb[21].mxu0 }
 0xc64   : > { %v2404_v10 = vadd.f32 %v2403_v9, %v2284_v28  ;;  %v2405_v12 = vpop.f32.mrb[22].mxu0 }
 0xc65   : > { %v2414_v13 = vmul.f32 0.044715, %v2402_v8  ;;  %v2406_v15 = vadd.f32 %v2405_v12, %v2280_v6  ;;  %v2407_v18 = vpop.f32.mrb[23].mxu0  ;;  %v2410_v41 = vmul.f32 0.5, %v2402_v8 }
 0xc66   : > { %v2415_v50 = vmul.f32 0.044715, %v2404_v10  ;;  %v2408_v53 = vadd.f32 %v2407_v18, %v2284_v28  ;;  %v2411_v46 = vmul.f32 0.5, %v2404_v10 }
 0xc67   : > { %v2418_v19 = vmul.f32 %v2414_v13, %v2402_v8  ;;  %v2416_v21 = vmul.f32 0.044715, %v2406_v15  ;;  %v2412_v42 = vmul.f32 0.5, %v2406_v15 }
 0xc68   : > { %v2419_v22 = vmul.f32 %v2415_v50, %v2404_v10  ;;  %v2417_v23 = vmul.f32 0.044715, %v2408_v53  ;;  %v2413_v47 = vmul.f32 0.5, %v2408_v53  ;;  %v3377_v50 = vld [vmem:[%s943_s3] ss:$0 sm:$0xff] }
 0xc69   : > { %v2422_v24 = vmul.f32 %v2418_v19, %v2402_v8  ;;  %v2420_v25 = vmul.f32 %v2416_v21, %v2406_v15  ;;  %v3378_v21 = vld [vmem:[%s951_s18] ss:$0 sm:$0xff] }
 0xc6a   : > { %v2423_v20 = vmul.f32 %v2419_v22, %v2404_v10  ;;  %v2421_v26 = vmul.f32 %v2417_v23, %v2408_v53 }
 0xc6b   : > { %v2426_v16 = vadd.f32 %v2422_v24, %v2402_v8  ;;  %v2424_v17 = vmul.f32 %v2420_v25, %v2406_v15 }
 0xc6c   : > { %v2425_v27 = vmul.f32 %v2421_v26, %v2408_v53  ;;  %v2427_v29 = vadd.f32 %v2423_v20, %v2404_v10  ;;  %v3947_v26 = vld [vmem:[#allocation22] sm:$0xff] (!%p3379_p0)  }
 0xc6d   : > { %v2430_v30 = vmul.f32 0.7978846, %v2426_v16  ;;  %v2428_v31 = vadd.f32 %v2424_v17, %v2406_v15  ;;  %v4577_v16 = vmov (!%p3379_p0), 0.0   ;;  %v3948_v17 = vld [vmem:[#allocation22 + $0x8] sm:$0xff] (!%p3379_p0)  }
 0xc6e   : > { %v2429_v32 = vadd.f32 %v2425_v27, %v2408_v53  ;;  %v2431_v11 = vmul.f32 0.7978846, %v2427_v29  ;;  %3567 = vmatprep.subr.bf16.mxu0 (!%p3379_p0), %v4577_v16  ;;  %3587 = vmatprep.subr.bf16.mxu1 (!%p3379_p0), %v4577_v16  ;;  %v3949_v27 = vld [vmem:[#allocation22 + $0x10] sm:$0xff] (!%p3379_p0)   ;;  %v3955_v29 = vld [vmem:[%s5727_s30] sm:$0xff] (!%p3379_p0)  }
 0xc6f   : > { %3935 = vtanh.f32 %v2430_v30  ;;  %v2432_v33 = vmul.f32 0.7978846, %v2428_v31  ;;  %3568 = vmatpush3.bf16.msra.mxu0 (!%p3379_p0), %v3947_v26  ;;  %3583 = vmatprep.mubr.msk.bf16.mxu0 (!%p3379_p0), %vm4578_vm3, %v4577_v16  ;;  %v3950_v30 = vld [vmem:[#allocation22 + $0x18] sm:$0xff] (!%p3379_p0)   ;;  %v3956_v31 = vld [vmem:[%s5727_s30 + $0x8] sm:$0xff] (!%p3379_p0)  }
 0xc70   : > { %v2433_v34 = vmul.f32 0.7978846, %v2429_v32  ;;  %3937 = vtanh.f32 %v2431_v11  ;;  %3569 = vmatprep.subr.bf16.mxu0 (!%p3379_p0), %v4577_v16  ;;  %v3951_v32 = vld [vmem:[#allocation22 + $0x20] sm:$0xff] (!%p3379_p0)   ;;  %v3957_v11 = vld [vmem:[%s5727_s30 + $0x10] sm:$0xff] (!%p3379_p0)  }
 0xc71   : > { %3939 = vtanh.f32 %v2432_v33 }
 0xc72   : > { %3941 = vtanh.f32 %v2433_v34  ;;  %v3952_v34 = vld [vmem:[#allocation22 + $0x28] sm:$0xff] (!%p3379_p0)  }
 0xc73   : > { %3570 = vmatpush3.bf16.msra.mxu0 (!%p3379_p0), %v3948_v17 }
 0xc74   : > { %3571 = vmatprep.subr.bf16.mxu0 (!%p3379_p0), %v4577_v16 }
 0xc77   : > { %3572 = vmatpush3.bf16.msra.mxu0 (!%p3379_p0), %v3949_v27 }
 0xc78   : > { %3573 = vmatprep.subr.bf16.mxu0 (!%p3379_p0), %v4577_v16 }
 0xc79   : > { %v3936_v35 = vpop.eup %3935 }
 0xc7a   : > { %v3938_v36 = vpop.eup %3937  ;;  %v2438_v37 = vadd.f32 1.0, %v3936_v35 }
 0xc7b   : > { %v3940_v38 = vpop.eup %3939  ;;  %v2439_v39 = vadd.f32 1.0, %v3938_v36  ;;  %3574 = vmatpush3.bf16.msra.mxu0 (!%p3379_p0), %v3950_v30 }
 0xc7c   : > { %v3942_v40 = vpop.eup %3941  ;;  %v2440_v44 = vadd.f32 1.0, %v3940_v38  ;;  %v2442_v51 = vmul.f32 %v2438_v37, %v2410_v41  ;;  %3575 = vmatprep.subr.bf16.mxu0 (!%p3379_p0), %v4577_v16  ;;  %v3958_v37 = vld [vmem:[%s5727_s30 + $0x18] sm:$0xff] (!%p3379_p0)   ;;  %v3953_v38 = vld [vmem:[#allocation22 + $0x30] sm:$0xff] (!%p3379_p0)  }
 0xc7d   : > { %v2441_v48 = vadd.f32 1.0, %v3942_v40  ;;  %v2443_v56 = vmul.f32 %v2439_v39, %v2411_v46  ;;  %v3954_v41 = vld [vmem:[#allocation22 + $0x38] sm:$0xff] (!%p3379_p0)   ;;  %v3959_v46 = vld [vmem:[%s5727_s30 + $0x20] sm:$0xff] (!%p3379_p0)  }
 0xc7e   : > { %v2444_v52 = vmul.f32 %v2440_v44, %v2412_v42 }
 0xc7f   : > { %v2445_v57 = vmul.f32 %v2441_v48, %v2413_v47  ;;  %3576 = vmatpush3.bf16.msra.mxu0 (!%p3379_p0), %v3951_v32  ;;  %v3960_v47 = vld [vmem:[%s5727_s30 + $0x28] sm:$0xff] (!%p3379_p0)   ;;  %v3961_v48 = vld [vmem:[%s5727_s30 + $0x30] sm:$0xff] (!%p3379_p0)  }
 0xc80   : > { %v2446_v58 = vpack.c.bf16 %v2444_v52, %v2442_v51  ;;  %3577 = vmatprep.subr.bf16.mxu0 (!%p3379_p0), %v4577_v16  ;;  %v3962_v51 = vld [vmem:[%s5727_s30 + $0x38] sm:$0xff] (!%p3379_p0)  }
 0xc81   : > { %v2447_v60 = vpack.c.bf16 %v2445_v57, %v2443_v56  ;;  %v3380_v52 = vld [vmem:[#allocation23] ss:$0 sm:$0xff] (!%p3379_p0) }
 0xc83   : > { %2615 = vmatprep.mubr.bf16.mxu1 %v2447_v60  ;;  %3578 = vmatpush3.bf16.msra.mxu0 (!%p3379_p0), %v3952_v34 }
 0xc84   : > { %2616 = vmatmul.mubr.bf16.vlgmr.msra.gmra.mrb[32].mxu1 %v2446_v58  ;;  %3579 = vmatprep.subr.bf16.mxu0 (!%p3379_p0), %v4577_v16 }
 0xc85   : > { %3603 = vmatprep.mubr.msk.bf16.mxu1 (!%p3379_p0), %vm4578_vm3, %v4577_v16  ;;  %3588 = vmatpush3.bf16.msra.mxu1 (!%p3379_p0), %v3955_v29 }
 0xc86   : > { %3589 = vmatprep.subr.bf16.mxu1 (!%p3379_p0), %v4577_v16 }
 0xc87   : > { %3580 = vmatpush3.bf16.msra.mxu0 (!%p3379_p0), %v3953_v38 }
 0xc88   : > { %3581 = vmatprep.subr.bf16.mxu0 (!%p3379_p0), %v4577_v16 }
 0xc89   : > { %3590 = vmatpush3.bf16.msra.mxu1 (!%p3379_p0), %v3956_v31 }
 0xc8a   : > { %3591 = vmatprep.subr.bf16.mxu1 (!%p3379_p0), %v4577_v16 }
 0xc8b   : > { %3582 = vmatpush3.bf16.msra.mxu0 (!%p3379_p0), %v3954_v41 }
 0xc8d   : > { %3592 = vmatpush3.bf16.msra.mxu1 (!%p3379_p0), %v3957_v11 }
 0xc8e   : > { %3593 = vmatprep.subr.bf16.mxu1 (!%p3379_p0), %v4577_v16 }
 0xc91   : > { %3594 = vmatpush3.bf16.msra.mxu1 (!%p3379_p0), %v3958_v37 }
 0xc92   : > { %3595 = vmatprep.subr.bf16.mxu1 (!%p3379_p0), %v4577_v16 }
 0xc95   : > { %3596 = vmatpush3.bf16.msra.mxu1 (!%p3379_p0), %v3959_v46 }
 0xc96   : > { %3597 = vmatprep.subr.bf16.mxu1 (!%p3379_p0), %v4577_v16 }
 0xc99   : > { %3598 = vmatpush3.bf16.msra.mxu1 (!%p3379_p0), %v3960_v47 }
 0xc9a   : > { %3599 = vmatprep.subr.bf16.mxu1 (!%p3379_p0), %v4577_v16 }
 0xc9d   : > { %3600 = vmatpush3.bf16.msra.mxu1 (!%p3379_p0), %v3961_v48 }
 0xc9e   : > { %3601 = vmatprep.subr.bf16.mxu1 (!%p3379_p0), %v4577_v16 }
 0xca1   : > { %3602 = vmatpush3.bf16.msra.mxu1 (!%p3379_p0), %v3962_v51 }
 0xd57   : > { %v3455_v61 = vpop.f32.mrb[32].mxu1 }
 0xd58   : > { %v3456_v43 = vpop.f32.mrb[33].mxu1 }
 0xd59   : > { %v3457_v0 = vadd.f32 %v3456_v43, %v3455_v61  ;;  %v3458_v14 = vpop.f32.mrb[34].mxu1 }
 0xd5a   : > { %v3459_v1 = vpop.f32.mrb[35].mxu1 }
 0xd5b   : > { %v2618_v49 = vadd.f32 %v3457_v0, %v3360_v62  ;;  %v3460_v59 = vadd.f32 %v3459_v1, %v3458_v14  ;;  %v3389_v0 = vld [vmem:[%s5728_s14] ss:$0 sm:$0xff] (!%p3379_p0) }
 0xd5d   : > { %v2621_v2 = vadd.f32 %v3460_v59, %v3360_v62  ;;  %v2624_v3 = vadd.f32 %v2618_v49, %v5474_v54 }
 0xd5f   : > { %2628 = vadd.xlane.f32.xlu0 %v2624_v3  ;;  %v2625_v45 = vadd.f32 %v2621_v2, %v5476_v55 }
 0xd61   : > { %2630 = vadd.xlane.f32.xlu1 %v2625_v45 }
 0xdec   : > { %v2629_v63 = vpop.xlane.xlu0 %2628 }
 0xded   : > { %v2632_v4 = vmul.f32 0.0078125, %v2629_v63 }
 0xdee   : > { %v2631_v5 = vpop.xlane.xlu1 %2630 }
 0xdef   : > { %v2634_v6 = vsub.f32 %v2624_v3, %v2632_v4  ;;  %v2633_v28 = vmul.f32 0.0078125, %v2631_v5 }
 0xdf1   : > { %v2635_v7 = vsub.f32 %v2625_v45, %v2633_v28  ;;  %v2636_v8 = vmul.f32 %v2634_v6, %v2634_v6 }
 0xdf3   : > { %2638 = vadd.xlane.f32.xlu0 %v2636_v8  ;;  %v2637_v9 = vmul.f32 %v2635_v7, %v2635_v7 }
 0xdf5   : > { %2640 = vadd.xlane.f32.xlu1 %v2637_v9 }
 0xe80   : > { %v2639_v10 = vpop.xlane.xlu0 %2638 }
 0xe81   : > { %v2642_v12 = vmul.f32 0.0078125, %v2639_v10 }
 0xe82   : > { %v2641_v13 = vpop.xlane.xlu1 %2640 }
 0xe83   : > { %v2644_v54 = vadd.f32 1e-12, %v2642_v12  ;;  %v2643_v15 = vmul.f32 0.0078125, %v2641_v13 }
 0xe85   : > { %3943 = vrsqrt.f32 %v2644_v54  ;;  %v2645_v55 = vadd.f32 1e-12, %v2643_v15 }
 0xe87   : > { %3945 = vrsqrt.f32 %v2645_v55 }
 0xe8f   : > { %v3944_v18 = vpop.eup %3943 }
 0xe90   : > { %v2648_v53 = vmul.f32 %v3944_v18, %v2634_v6 }
 0xe91   : > { %v3946_v19 = vpop.eup %3945 }
 0xe92   : > { %v2656_v22 = vmul.f32 %v3377_v50, %v2648_v53  ;;  %v2649_v23 = vmul.f32 %v3946_v19, %v2635_v7  ;;  %2671 = sbr.rel (%p3379_p0) target bundleno = 4187 (0x105b), region = 176 }
 0xe94   : > { %v2664_v24 = vadd.f32 %v3378_v21, %v2656_v22  ;;  %v2657_v25 = vmul.f32 %v3377_v50, %v2649_v23 }
 0xe96   : > { %2666 = vst [vmem:[#allocation2] sm:$0xff] %v2664_v24  ;;  %v2665_v20 = vadd.f32 %v3378_v21, %v2657_v25  ;;  %v2672_v35 = vpack.c.bf16 (!%p3379_p0), %v2664_v24, %v2664_v24 }
 0xe98   : > { %2667 = vst [vmem:[#allocation2 + $0x8] sm:$0xff] %v2665_v20  ;;  %v2673_v33 = vpack.c.bf16 (!%p3379_p0), %v2665_v20, %v2665_v20  ;;  %v2699_v39 = vunpack.c.l.b16 (!%p3379_p0), %v2672_v35 }
 0xe9a   : > { %v2700_v36 = vunpack.c.l.b16 %v2673_v33 }
 0xe9c   : > { %v2701_v40 = vrot.slane %v2700_v36, 7 }
 0xe9e   : > { %v2703_v42 = vsel %vm2702_vm4, %v2701_v40, %v2699_v39 }
 0xe9f   : > { %v2704_v44 = vpack.c.b16 %v2703_v42, %v2703_v42 }
 0xea1   : > { %3584 = vmatmul.mubr.bf16.vlgmr.msra.gmra.mrb[0].mxu0 %v2704_v44 }
 0xf74   : > { %v2788_v56 = vpop.f32.mrb[0].mxu0 }
 0xf75   : > { %v2789_v57 = vadd.f32 %v3380_v52, %v2788_v56  ;;  %v3585_v58 = vpop.f32.mrb[1].mxu0 }
 0xf76   : > { %v2791_v60 = vpop.f32.mrb[2].mxu0 }
 0xf77   : > { %3963 = vtanh.f32 %v2789_v57  ;;  %v3586_v61 = vpop.f32.mrb[3].mxu0 }
 0xf81   : > { %v3964_v62 = vpop.eup %3963 }
 0xf82   : > { %v2795_v43 = vpack.c.bf16 %v3964_v62, %v3964_v62 }
 0xf84   : > { %3604 = vmatmul.mubr.bf16.vlgmr.msra.gmra.mrb[0].mxu1 %v2795_v43 }
0x1057   : > { %v2901_v14 = vpop.f32.mrb[0].mxu1 }
0x1058   : > { %v2902_v1 = vadd.f32 %v3389_v0, %v2901_v14  ;;  %v3605_v49 = vpop.f32.mrb[1].mxu1 }
0x1059   : > { %v2904_v59 = vpop.f32.mrb[2].mxu1 }
0x105a   : > { %2907 = vst [vmem:[#allocation24] sm:$0x3] %v2902_v1  ;;  %v3606_v2 = vpop.f32.mrb[3].mxu1 }
0x105b PF: > { %s5729_s26 = sld [smem:[#allocation34_spill]]  ;;  %s4579_s23 = smov [#allocation24]  }
0x105c   : > { %s2915_s20 = sshll.u32 %s4579_s23, 4  ;;  %s2916_s20 = int_to_ptr.vmem [resolvable:$true] %s2915_s20 }
0x105d   : > { %s4463_s0 = scalar_lea.vmem %s2916_s20, 32  ;;  %p4470_p8 = scmp.lt.s32.totalorder %s2916_s20, %s2916_s20 }
0x105e   : > { %p4464_p12 = scmp.ne.s32.totalorder %s2916_s20, %s4463_s0  ;;  %p4471_p9 = scmp.lt.s32.totalorder %s4463_s0, %s4463_s0 }
0x1060   : > { %p4472_p6 = por %p4471_p9, %p4470_p8 }
0x1061   : > { %p3729_p5 = scmp.eq.s32.totalorder %s5729_s26, 1 }
0x1063   : > { %p4465_p4 = pnand %p4464_p12, %p3729_p5 }
0x1065   : > { %p4466_p10 = pneg %p4465_p4 }
0x1067   : > { %p4473_p13 = pnand %p4472_p6, %p4466_p10 }
0x1069   : > { %4476 = shalt.err (!%p4473_p13)
}
0x106a   : > { %s5730_s7 = sld [smem:[#allocation58_spill]] }
0x1070   : > { %s4477_s10 = scalar_lea.hbm %s5730_s7, 32 }
0x1071   : > { %p4478_p1 = scmp.ne.s32.totalorder %s5730_s7, %s4477_s10  ;;  %p4483_p2 = scmp.lt.u32.totalorder %s4477_s10, %s5730_s7 }
0x1073   : > { %p4479_p3 = pnand %p4478_p1, %p3729_p5 }
0x1075   : > { %p4480_p7 = pneg %p4479_p3 }
0x1077   : > { %p4485_p11 = pnand %p4483_p2, %p4480_p7 }
0x1079   : > { %4488 = shalt.err (!%p4485_p11)
}
0x107a   : > { %3660 = dma.vmem_to_hbm [thread:$0]  (%p3729_p5), %s2916_s20, 32, %s5730_s7, [#allocation5]  }
0x107b   : > { %4530 = dma.done.wait (%p3729_p5), [#allocation5], 32  }
0x107c   : > { %4532 = vsyncadd (%p3729_p5), [#allocation5], 4294967264 }
0x107d PF: > { %s5731_s24 = sld [smem:[#allocation35_spill]]  ;;  %s5732_s1 = sld [smem:[#allocation32_spill]] }
0x107e   : > { %s5733_s22 = sld [smem:[#allocation33_spill]]  ;;  %s5734_s23 = sld [smem:[#allocation36_spill]] }
0x1083   : > { %p31_p0 = scmp.ge.s32.totalorder %s5731_s24, 4  }
0x1085   :  { %33 = sbr.rel (!%p31_p0) target bundleno = 26 (0x1a), region = 282 }
0x108c   :  { %2928 = vsyncpa [#allocation4], 1 }
0x108d   :  { %2930 = vsyncpa [#allocation4 + $0x1], 1 }
0x108e   :  { %2931 = vsyncpa [#allocation7], 1 }
0x108f   :  { %2932 = vsyncpa [#allocation10], 1 }
0x1090   :  { %2933 = vsyncpa [#allocation5], 1 }
0x1091   :  { %2935 = vsyncpa [#allocation5 + $0x1], 1 }

</bundles_post_ra>
